<compile_context>
chip_gen: v7x
topology: tpu7x:2x2x1
jax: 0.10.0
libtpu: 0.0.40
codegen_flags: <defaults>
</compile_context>

<pallas_src>
import functools

import numpy as np

import jax
import jax.numpy as jnp
from jax.experimental import pallas as pl
from jax.experimental.pallas import tpu as pltpu


# --------------------------------------------------------------------------
# Pallas kernel
# --------------------------------------------------------------------------
def _make_bam_kernel(H, W, C, Cr, dil, Bb):
    HW = H * W
    # 3x3 tap offsets (dy, dx), k = 3*ky + kx (matches weight & mask packing).
    tap_offsets = [((ky - 1) * dil, (kx - 1) * dil)
                   for ky in range(3) for kx in range(3)]

    def tap_contract(w_k, tap):
        # (Cr, Cr) x (Cr, HW) -> (Cr, HW), f32.
        if Cr <= 8:
            # Tiny channel count: a few broadcast multiply-adds on the VPU
            # beat a 2x2-ish MXU push and avoid small-operand relayouts.
            out = w_k[:, 0:1] * tap[0:1, :]
            for ci in range(1, Cr):
                out = out + w_k[:, ci:ci + 1] * tap[ci:ci + 1, :]
            return out
        return jnp.dot(w_k, tap, preferred_element_type=jnp.float32)

    def kernel(x_ref, ca_ref, mask_ref,
               srw_ref, srb_ref,                        # spatial reduce 1x1 conv
               sdw1_ref, sdb1_ref, sdw2_ref, sdb2_ref,  # dilated conv taps
               sfw_ref, sfb_ref,                        # final 1x1 conv (Cr -> 1)
               o_ref):
        # Hoist all (tiny) weight / mask loads out of the per-image loop.
        srw = srw_ref[...]                               # (Cr, C)
        srb = srb_ref[...]                               # (Cr, 1)
        sfw = sfw_ref[...]                               # (Cr, 1)
        sfb = sfb_ref[...]                               # (1, 1)
        b1 = sdb1_ref[...]                               # (Cr, 1)
        b2 = sdb2_ref[...]                               # (Cr, 1)
        w1 = [sdw1_ref[k] for k in range(9)]             # 9 x (Cr, Cr)
        w2 = [sdw2_ref[k] for k in range(9)]
        masks = [mask_ref[k] for k in range(9)]          # 9 x (1, HW), {0,1} f32

        def dilated_conv(f, w_list, bias):
            # 3x3 conv, dilation=dil, "same" zero padding, channel-major
            # (Cr, HW): each tap is an XLU lane roll of the flattened image
            # multiplied by a precomputed 0/1 boundary mask.  No concat, no
            # strided reshape, no padded scratch.
            acc = tap_contract(w_list[4], f)             # center tap, no roll
            for k, (dy, dx) in enumerate(tap_offsets):
                if dy == 0 and dx == 0:
                    continue
                shift = (-(dy * W + dx)) % HW            # tap[p] = f[p + dy*W + dx]
                tap = pltpu.roll(f, shift, axis=1) * masks[k]
                acc = acc + tap_contract(w_list[k], tap)
            return jnp.maximum(acc + bias, 0.0)          # (Cr, HW)

        def one_image(b, carry):
            x = x_ref[b].astype(jnp.float32)             # (C, HW), lane-dense

            # ---------------- spatial attention ----------------
            # 1x1 reduce conv (+ folded BN) + relu; MXU N-dim is HW.
            f = jnp.maximum(
                jnp.dot(srw, x, preferred_element_type=jnp.float32) + srb,
                0.0)                                     # (Cr, HW)
            f = dilated_conv(f, w1, b1)
            f = dilated_conv(f, w2, b2)
            # final 1x1 conv to one channel: sublane reduce -> lane-dense row
            sa = jnp.sum(f * sfw, axis=0, keepdims=True) + sfb   # (1, HW)

            # ------- combine (channel attention precomputed) -------
            # TODO(synk): if the (C, HW) sigmoid ever binds the single EUP on
            #   v6e/v7x, evaluate it in bf16 there (not supported on v5e).
            att = 1.0 + jax.nn.sigmoid(ca_ref[b] + sa)   # (C,1)+(1,HW)->(C,HW)
            o_ref[b] = (att * x).astype(o_ref.dtype)
            return carry

        if Bb == 1:
            one_image(0, 0)
        else:
            # Real loop (not a static unroll) keeps vreg live ranges bounded.
            jax.lax.fori_loop(0, Bb, one_image, 0)

    return kernel


# --------------------------------------------------------------------------
# Wrapper helpers
# --------------------------------------------------------------------------
def _tap_masks(H, W, dil):
    """(9, 1, H*W) {0,1} float32 validity masks for the 9 dilated-conv taps."""
    HW = H * W
    col = np.arange(HW, dtype=np.int64) % W
    row = np.arange(HW, dtype=np.int64) // W
    ms = []
    for ky in range(3):
        for kx in range(3):
            dy, dx = (ky - 1) * dil, (kx - 1) * dil
            ok = ((row + dy >= 0) & (row + dy < H)
                  & (col + dx >= 0) & (col + dx < W))
            ms.append(ok.astype(np.float32))
    return jnp.asarray(np.stack(ms)[:, None, :])


def _vmem_limit_bytes():
    # Generation-aware budget: ~3/4 of physical VMEM, capped at 96 MiB.
    # v5e/v6e have 128 MiB physical -> 96 MiB; v7x has 64 MiB -> 48 MiB.
    try:
        cap = int(pltpu.get_tpu_info().vmem_capacity_bytes)
    except Exception:   # conservative fallback that fits every generation
        cap = 64 * 1024 * 1024
    return int(max(32 * 1024 * 1024, min(96 * 1024 * 1024, (cap * 3) // 4)))


def _pick_batch_block(B, C, HW, Cr, io_bytes):
    # Per-image VMEM: double-buffered in/out blocks + live f32 temporaries
    # (f32 copy of x, att, and the f / rolled-tap / acc buffers).
    per_image = (2 * 2 * io_bytes * C * HW
                 + 4 * C * HW * 2
                 + 4 * max(Cr, 8) * HW * 4)
    budget = 48 * 1024 * 1024
    max_bb = max(1, min(8, budget // max(per_image, 1)))
    if B >= 2:
        max_bb = min(max_bb, B // 2)   # >= 2 grid steps: keep both v7x cores busy
    for d in range(int(max_bb), 0, -1):
        if B % d == 0:
            return d
    return 1


# --------------------------------------------------------------------------
# Wrapper
# --------------------------------------------------------------------------
@functools.partial(jax.jit, static_argnames=("dil", "io_dtype"))
def bam_forward(x_nchw, params, dil=4, io_dtype=jnp.bfloat16):
    B, C, H, W = x_nchw.shape
    Cr = params["srw"].shape[0]
    HW = H * W

    # NCHW flattened to (B, C, HW): channels on sublanes, pixels on lanes.
    # No wrapper transposes; bf16 I/O halves HBM traffic (f32 compute inside).
    x_flat = x_nchw.reshape(B, C, HW).astype(io_dtype)

    # Channel attention (global avg pool + two tiny matmuls) hoisted out of
    # the kernel; passed in as a (B, C, 1) f32 input.
    pooled = jnp.mean(x_flat.astype(jnp.float32), axis=2)            # (B, C)
    hmid = jnp.maximum(pooled @ params["caw1"] + params["cab1"], 0.0)
    ca = (hmid @ params["caw2"] + params["cab2"])[:, :, None]        # (B, C, 1)

    masks = _tap_masks(H, W, dil)                                    # (9,1,HW)

    weight_names = ("srw", "srb", "sdw1", "sdb1", "sdw2", "sdb2", "sfw", "sfb")
    weights = [params[k] for k in weight_names]

    Bb = _pick_batch_block(B, C, HW, Cr, jnp.dtype(io_dtype).itemsize)

    def _full(p):
        return pl.BlockSpec(p.shape, lambda b, _nd=p.ndim: (0,) * _nd)

    in_specs = [pl.BlockSpec((Bb, C, HW), lambda b: (b, 0, 0)),
                pl.BlockSpec((Bb, C, 1), lambda b: (b, 0, 0)),
                _full(masks)]
    in_specs += [_full(p) for p in weights]

    kernel = _make_bam_kernel(H, W, C, Cr, dil, Bb)
    out_flat = pl.pallas_call(
        kernel,
        out_shape=jax.ShapeDtypeStruct((B, C, HW), io_dtype),
        grid=(B // Bb,),
        in_specs=in_specs,
        out_specs=pl.BlockSpec((Bb, C, HW), lambda b: (b, 0, 0)),
        compiler_params=pltpu.CompilerParams(
            dimension_semantics=("parallel",),
            vmem_limit_bytes=_vmem_limit_bytes()),
    )(x_flat, ca, masks, *weights)

    return out_flat.reshape(B, C, H, W)


# --------------------------------------------------------------------------
# Deterministic parameter init (matches PyTorch module shapes) + BN folding
# --------------------------------------------------------------------------
def _conv_init(key, cout, cin, kh, kw):
    fan_in = cin * kh * kw
    bound = 1.0 / (fan_in ** 0.5)
    kw_, kb_ = jax.random.split(key)
    w = jax.random.uniform(kw_, (cout, cin, kh, kw), jnp.float32, -bound, bound)
    b = jax.random.uniform(kb_, (cout,), jnp.float32, -bound, bound)
    return w, b


def _bn_init(key, ch):
    k1, k2, k3, k4 = jax.random.split(key, 4)
    gamma = jax.random.uniform(k1, (ch,), jnp.float32, 0.5, 1.5)
    beta = jax.random.normal(k2, (ch,), jnp.float32) * 0.1
    mean = jax.random.normal(k3, (ch,), jnp.float32) * 0.1
    var = jax.random.uniform(k4, (ch,), jnp.float32, 0.5, 1.5)
    return gamma, beta, mean, var


def _fold_bn_1x1_t(w, b, bn, eps=1e-5):
    # w: (cout, cin, 1, 1) -> channel-major folded weight (cout, cin), bias (cout, 1)
    gamma, beta, mean, var = bn
    scale = gamma / jnp.sqrt(var + eps)
    wm = w[:, :, 0, 0] * scale[:, None]
    bm = ((b - mean) * scale + beta)[:, None]
    return wm, bm


def _fold_bn_3x3_taps(w, b, bn, eps=1e-5):
    # w: (cout, cin, 3, 3) -> per-tap weights (9, cout, cin), bias (cout, 1)
    gamma, beta, mean, var = bn
    scale = gamma / jnp.sqrt(var + eps)
    wf = w * scale[:, None, None, None]
    taps = jnp.stack([wf[:, :, ky, kx] for ky in range(3) for kx in range(3)])
    bm = ((b - mean) * scale + beta)[:, None]
    return taps, bm


def init_bam_params(key, in_channels, reduction=16):
    C = in_channels
    Cr = max(1, C // reduction)
    ks = jax.random.split(key, 10)

    # channel attention: conv(C->Cr) + BN + relu + conv(Cr->C)
    w0, b0 = _conv_init(ks[0], Cr, C, 1, 1)
    bn_ca = _bn_init(ks[1], Cr)
    w0m, b0m = _fold_bn_1x1_t(w0, b0, bn_ca)           # (Cr, C), (Cr, 1)
    caw1, cab1 = w0m.T, b0m[:, 0]                      # (C, Cr), (Cr,)
    w1, b1 = _conv_init(ks[2], C, Cr, 1, 1)
    caw2, cab2 = w1[:, :, 0, 0].T, b1                  # (Cr, C), (C,)

    # spatial attention: reduce conv(C->Cr)+BN+relu, 2x dilated conv(Cr->Cr)+BN+relu,
    # final conv(Cr->1)
    wr, br = _conv_init(ks[3], Cr, C, 1, 1)
    bn_r = _bn_init(ks[4], Cr)
    srw, srb = _fold_bn_1x1_t(wr, br, bn_r)            # (Cr, C), (Cr, 1)

    wd1, bd1 = _conv_init(ks[5], Cr, Cr, 3, 3)
    bn_d1 = _bn_init(ks[6], Cr)
    sdw1, sdb1 = _fold_bn_3x3_taps(wd1, bd1, bn_d1)    # (9, Cr, Cr), (Cr, 1)

    wd2, bd2 = _conv_init(ks[7], Cr, Cr, 3, 3)
    bn_d2 = _bn_init(ks[8], Cr)
    sdw2, sdb2 = _fold_bn_3x3_taps(wd2, bd2, bn_d2)

    wf, bf = _conv_init(ks[9], 1, Cr, 1, 1)
    sfw = wf[:, :, 0, 0].T                             # (Cr, 1)
    sfb = bf[None, :]                                  # (1, 1)

    return dict(caw1=caw1, cab1=cab1, caw2=caw2, cab2=cab2,
                srw=srw, srb=srb, sdw1=sdw1, sdb1=sdb1,
                sdw2=sdw2, sdb2=sdb2, sfw=sfw, sfb=sfb)


# --------------------------------------------------------------------------
# Pure-JAX reference (independent pad-based conv) for correctness check
# --------------------------------------------------------------------------
def bam_reference(x_nchw, params, dil=4):
    B, C, H, W = x_nchw.shape
    Cr = params["srw"].shape[0]
    xc = x_nchw.reshape(B, C, H * W)

    pooled = jnp.mean(xc, axis=2)                                    # (B, C)
    hmid = jnp.maximum(pooled @ params["caw1"] + params["cab1"], 0.0)
    ca = (hmid @ params["caw2"] + params["cab2"])[:, :, None]        # (B, C, 1)

    xhwc = jnp.transpose(x_nchw, (0, 2, 3, 1))                       # (B, H, W, C)
    f = jnp.maximum(xhwc @ params["srw"].T + params["srb"][:, 0], 0.0)
    for wt, bt in ((params["sdw1"], params["sdb1"]),
                   (params["sdw2"], params["sdb2"])):
        pad = jnp.pad(f, ((0, 0), (dil, dil), (dil, dil), (0, 0)))
        acc = jnp.zeros(f.shape, jnp.float32)
        for ky in range(3):
            for kx in range(3):
                sl = pad[:, ky * dil:ky * dil + H, kx * dil:kx * dil + W, :]
                acc = acc + sl @ wt[3 * ky + kx].T
        f = jnp.maximum(acc + bt[:, 0], 0.0)
    sa = f.reshape(B, H * W, Cr) @ params["sfw"] + params["sfb"]     # (B, HW, 1)
    sa = jnp.transpose(sa, (0, 2, 1))                                # (B, 1, HW)

    att = 1.0 + jax.nn.sigmoid(ca + sa)                              # (B, C, HW)
    out = att * xc
    return out.reshape(B, C, H, W)


# --------------------------------------------------------------------------
if __name__ == "__main__":
    B, C, H, W = 2, 32, 16, 16          # reduction=16 -> Cr = 2; HW = 256 (lane-dense)
    key = jax.random.PRNGKey(0)
    kx_, kp_ = jax.random.split(key)
    x = jax.random.normal(kx_, (B, C, H, W), jnp.float32)

    params = init_bam_params(kp_, in_channels=C, reduction=16)

    out = jax.block_until_ready(bam_forward(x, params, dil=4))
    assert out.shape == (B, C, H, W)

    # Reference uses the same bf16-quantized input, so the only divergence is
    # f32 accumulation order plus the final bf16 store of the kernel output.
    x_q = x.astype(jnp.bfloat16).astype(jnp.float32)
    ref = jax.block_until_ready(bam_reference(x_q, params, dil=4))
    out_f32 = out.astype(jnp.float32)
    err = float(jnp.max(jnp.abs(out_f32 - ref)))
    assert jnp.allclose(out_f32, ref, atol=3e-2, rtol=3e-2), err

    print("KERNEL_OK")
</pallas_src>

<mosaic_0001>
module attributes {stable_mosaic.version = 11 : i64} {
  func.func @kernel(%arg0: i32, %arg1: memref<1x32x256xbf16, #tpu.memory_space<vmem>>, %arg2: memref<1x32x1xf32, #tpu.memory_space<vmem>>, %arg3: memref<9x1x256xf32, #tpu.memory_space<vmem>>, %arg4: memref<2x32xf32, #tpu.memory_space<vmem>>, %arg5: memref<2x1xf32, #tpu.memory_space<vmem>>, %arg6: memref<9x2x2xf32, #tpu.memory_space<vmem>>, %arg7: memref<2x1xf32, #tpu.memory_space<vmem>>, %arg8: memref<9x2x2xf32, #tpu.memory_space<vmem>>, %arg9: memref<2x1xf32, #tpu.memory_space<vmem>>, %arg10: memref<2x1xf32, #tpu.memory_space<vmem>>, %arg11: memref<1x1xf32, #tpu.memory_space<vmem>>, %arg12: memref<1x32x256xbf16, #tpu.memory_space<vmem>>) attributes {dimension_semantics = [#tpu.dimension_semantics<parallel>], iteration_bounds = array<i64: 2>, scalar_prefetch = 0 : i64, scratch_operands = 0 : i64, tpu.core_type = #tpu.core_type<tc>, window_params = [{transform_indices = @transform_0, window_bounds = array<i64: 1, 32, 256>}, {transform_indices = @transform_1, window_bounds = array<i64: 1, 32, 1>}, {pipeline_mode = #tpu.pipeline_mode<synchronous>, transform_indices = @transform_2, window_bounds = array<i64: 9, 1, 256>}, {pipeline_mode = #tpu.pipeline_mode<synchronous>, transform_indices = @transform_3, window_bounds = array<i64: 2, 32>}, {pipeline_mode = #tpu.pipeline_mode<synchronous>, transform_indices = @transform_4, window_bounds = array<i64: 2, 1>}, {pipeline_mode = #tpu.pipeline_mode<synchronous>, transform_indices = @transform_5, window_bounds = array<i64: 9, 2, 2>}, {pipeline_mode = #tpu.pipeline_mode<synchronous>, transform_indices = @transform_6, window_bounds = array<i64: 2, 1>}, {pipeline_mode = #tpu.pipeline_mode<synchronous>, transform_indices = @transform_7, window_bounds = array<i64: 9, 2, 2>}, {pipeline_mode = #tpu.pipeline_mode<synchronous>, transform_indices = @transform_8, window_bounds = array<i64: 2, 1>}, {pipeline_mode = #tpu.pipeline_mode<synchronous>, transform_indices = @transform_9, window_bounds = array<i64: 2, 1>}, {pipeline_mode = #tpu.pipeline_mode<synchronous>, transform_indices = @transform_10, window_bounds = array<i64: 1, 1>}, {transform_indices = @transform_11, window_bounds = array<i64: 1, 32, 256>}]} {
    %c0 = arith.constant 0 : index
    %c0_0 = arith.constant 0 : index
    %0 = vector.load %arg4[%c0, %c0_0] : memref<2x32xf32, #tpu.memory_space<vmem>>, vector<2x32xf32>
    %c0_1 = arith.constant 0 : index
    %c0_2 = arith.constant 0 : index
    %1 = vector.load %arg5[%c0_1, %c0_2] : memref<2x1xf32, #tpu.memory_space<vmem>>, vector<2x1xf32>
    %c0_3 = arith.constant 0 : index
    %c0_4 = arith.constant 0 : index
    %2 = vector.load %arg10[%c0_3, %c0_4] : memref<2x1xf32, #tpu.memory_space<vmem>>, vector<2x1xf32>
    %c0_5 = arith.constant 0 : index
    %c0_6 = arith.constant 0 : index
    %3 = vector.load %arg11[%c0_5, %c0_6] : memref<1x1xf32, #tpu.memory_space<vmem>>, vector<1x1xf32>
    %c0_7 = arith.constant 0 : index
    %c0_8 = arith.constant 0 : index
    %4 = vector.load %arg7[%c0_7, %c0_8] : memref<2x1xf32, #tpu.memory_space<vmem>>, vector<2x1xf32>
    %c0_9 = arith.constant 0 : index
    %c0_10 = arith.constant 0 : index
    %5 = vector.load %arg9[%c0_9, %c0_10] : memref<2x1xf32, #tpu.memory_space<vmem>>, vector<2x1xf32>
    %c0_11 = arith.constant 0 : index
    %c0_12 = arith.constant 0 : index
    %c0_13 = arith.constant 0 : index
    %6 = vector.load %arg6[%c0_11, %c0_12, %c0_13] : memref<9x2x2xf32, #tpu.memory_space<vmem>>, vector<1x2x2xf32>
    %7 = vector.shape_cast %6 : vector<1x2x2xf32> to vector<2x2xf32>
    %c1 = arith.constant 1 : index
    %c0_14 = arith.constant 0 : index
    %c0_15 = arith.constant 0 : index
    %8 = vector.load %arg6[%c1, %c0_14, %c0_15] : memref<9x2x2xf32, #tpu.memory_space<vmem>>, vector<1x2x2xf32>
    %9 = vector.shape_cast %8 : vector<1x2x2xf32> to vector<2x2xf32>
    %c2 = arith.constant 2 : index
    %c0_16 = arith.constant 0 : index
    %c0_17 = arith.constant 0 : index
    %10 = vector.load %arg6[%c2, %c0_16, %c0_17] : memref<9x2x2xf32, #tpu.memory_space<vmem>>, vector<1x2x2xf32>
    %11 = vector.shape_cast %10 : vector<1x2x2xf32> to vector<2x2xf32>
    %c3 = arith.constant 3 : index
    %c0_18 = arith.constant 0 : index
    %c0_19 = arith.constant 0 : index
    %12 = vector.load %arg6[%c3, %c0_18, %c0_19] : memref<9x2x2xf32, #tpu.memory_space<vmem>>, vector<1x2x2xf32>
    %13 = vector.shape_cast %12 : vector<1x2x2xf32> to vector<2x2xf32>
    %c4 = arith.constant 4 : index
    %c0_20 = arith.constant 0 : index
    %c0_21 = arith.constant 0 : index
    %14 = vector.load %arg6[%c4, %c0_20, %c0_21] : memref<9x2x2xf32, #tpu.memory_space<vmem>>, vector<1x2x2xf32>
    %15 = vector.shape_cast %14 : vector<1x2x2xf32> to vector<2x2xf32>
    %c5 = arith.constant 5 : index
    %c0_22 = arith.constant 0 : index
    %c0_23 = arith.constant 0 : index
    %16 = vector.load %arg6[%c5, %c0_22, %c0_23] : memref<9x2x2xf32, #tpu.memory_space<vmem>>, vector<1x2x2xf32>
    %17 = vector.shape_cast %16 : vector<1x2x2xf32> to vector<2x2xf32>
    %c6 = arith.constant 6 : index
    %c0_24 = arith.constant 0 : index
    %c0_25 = arith.constant 0 : index
    %18 = vector.load %arg6[%c6, %c0_24, %c0_25] : memref<9x2x2xf32, #tpu.memory_space<vmem>>, vector<1x2x2xf32>
    %19 = vector.shape_cast %18 : vector<1x2x2xf32> to vector<2x2xf32>
    %c7 = arith.constant 7 : index
    %c0_26 = arith.constant 0 : index
    %c0_27 = arith.constant 0 : index
    %20 = vector.load %arg6[%c7, %c0_26, %c0_27] : memref<9x2x2xf32, #tpu.memory_space<vmem>>, vector<1x2x2xf32>
    %21 = vector.shape_cast %20 : vector<1x2x2xf32> to vector<2x2xf32>
    %c8 = arith.constant 8 : index
    %c0_28 = arith.constant 0 : index
    %c0_29 = arith.constant 0 : index
    %22 = vector.load %arg6[%c8, %c0_28, %c0_29] : memref<9x2x2xf32, #tpu.memory_space<vmem>>, vector<1x2x2xf32>
    %23 = vector.shape_cast %22 : vector<1x2x2xf32> to vector<2x2xf32>
    %c0_30 = arith.constant 0 : index
    %c0_31 = arith.constant 0 : index
    %c0_32 = arith.constant 0 : index
    %24 = vector.load %arg8[%c0_30, %c0_31, %c0_32] : memref<9x2x2xf32, #tpu.memory_space<vmem>>, vector<1x2x2xf32>
    %25 = vector.shape_cast %24 : vector<1x2x2xf32> to vector<2x2xf32>
    %c1_33 = arith.constant 1 : index
    %c0_34 = arith.constant 0 : index
    %c0_35 = arith.constant 0 : index
    %26 = vector.load %arg8[%c1_33, %c0_34, %c0_35] : memref<9x2x2xf32, #tpu.memory_space<vmem>>, vector<1x2x2xf32>
    %27 = vector.shape_cast %26 : vector<1x2x2xf32> to vector<2x2xf32>
    %c2_36 = arith.constant 2 : index
    %c0_37 = arith.constant 0 : index
    %c0_38 = arith.constant 0 : index
    %28 = vector.load %arg8[%c2_36, %c0_37, %c0_38] : memref<9x2x2xf32, #tpu.memory_space<vmem>>, vector<1x2x2xf32>
    %29 = vector.shape_cast %28 : vector<1x2x2xf32> to vector<2x2xf32>
    %c3_39 = arith.constant 3 : index
    %c0_40 = arith.constant 0 : index
    %c0_41 = arith.constant 0 : index
    %30 = vector.load %arg8[%c3_39, %c0_40, %c0_41] : memref<9x2x2xf32, #tpu.memory_space<vmem>>, vector<1x2x2xf32>
    %31 = vector.shape_cast %30 : vector<1x2x2xf32> to vector<2x2xf32>
    %c4_42 = arith.constant 4 : index
    %c0_43 = arith.constant 0 : index
    %c0_44 = arith.constant 0 : index
    %32 = vector.load %arg8[%c4_42, %c0_43, %c0_44] : memref<9x2x2xf32, #tpu.memory_space<vmem>>, vector<1x2x2xf32>
    %33 = vector.shape_cast %32 : vector<1x2x2xf32> to vector<2x2xf32>
    %c5_45 = arith.constant 5 : index
    %c0_46 = arith.constant 0 : index
    %c0_47 = arith.constant 0 : index
    %34 = vector.load %arg8[%c5_45, %c0_46, %c0_47] : memref<9x2x2xf32, #tpu.memory_space<vmem>>, vector<1x2x2xf32>
    %35 = vector.shape_cast %34 : vector<1x2x2xf32> to vector<2x2xf32>
    %c6_48 = arith.constant 6 : index
    %c0_49 = arith.constant 0 : index
    %c0_50 = arith.constant 0 : index
    %36 = vector.load %arg8[%c6_48, %c0_49, %c0_50] : memref<9x2x2xf32, #tpu.memory_space<vmem>>, vector<1x2x2xf32>
    %37 = vector.shape_cast %36 : vector<1x2x2xf32> to vector<2x2xf32>
    %c7_51 = arith.constant 7 : index
    %c0_52 = arith.constant 0 : index
    %c0_53 = arith.constant 0 : index
    %38 = vector.load %arg8[%c7_51, %c0_52, %c0_53] : memref<9x2x2xf32, #tpu.memory_space<vmem>>, vector<1x2x2xf32>
    %39 = vector.shape_cast %38 : vector<1x2x2xf32> to vector<2x2xf32>
    %c8_54 = arith.constant 8 : index
    %c0_55 = arith.constant 0 : index
    %c0_56 = arith.constant 0 : index
    %40 = vector.load %arg8[%c8_54, %c0_55, %c0_56] : memref<9x2x2xf32, #tpu.memory_space<vmem>>, vector<1x2x2xf32>
    %41 = vector.shape_cast %40 : vector<1x2x2xf32> to vector<2x2xf32>
    %c0_57 = arith.constant 0 : index
    %c0_58 = arith.constant 0 : index
    %c0_59 = arith.constant 0 : index
    %42 = vector.load %arg3[%c0_57, %c0_58, %c0_59] : memref<9x1x256xf32, #tpu.memory_space<vmem>>, vector<1x1x256xf32>
    %43 = vector.shape_cast %42 : vector<1x1x256xf32> to vector<1x256xf32>
    %c1_60 = arith.constant 1 : index
    %c0_61 = arith.constant 0 : index
    %c0_62 = arith.constant 0 : index
    %44 = vector.load %arg3[%c1_60, %c0_61, %c0_62] : memref<9x1x256xf32, #tpu.memory_space<vmem>>, vector<1x1x256xf32>
    %45 = vector.shape_cast %44 : vector<1x1x256xf32> to vector<1x256xf32>
    %c2_63 = arith.constant 2 : index
    %c0_64 = arith.constant 0 : index
    %c0_65 = arith.constant 0 : index
    %46 = vector.load %arg3[%c2_63, %c0_64, %c0_65] : memref<9x1x256xf32, #tpu.memory_space<vmem>>, vector<1x1x256xf32>
    %47 = vector.shape_cast %46 : vector<1x1x256xf32> to vector<1x256xf32>
    %c3_66 = arith.constant 3 : index
    %c0_67 = arith.constant 0 : index
    %c0_68 = arith.constant 0 : index
    %48 = vector.load %arg3[%c3_66, %c0_67, %c0_68] : memref<9x1x256xf32, #tpu.memory_space<vmem>>, vector<1x1x256xf32>
    %49 = vector.shape_cast %48 : vector<1x1x256xf32> to vector<1x256xf32>
    %c5_69 = arith.constant 5 : index
    %c0_70 = arith.constant 0 : index
    %c0_71 = arith.constant 0 : index
    %50 = vector.load %arg3[%c5_69, %c0_70, %c0_71] : memref<9x1x256xf32, #tpu.memory_space<vmem>>, vector<1x1x256xf32>
    %51 = vector.shape_cast %50 : vector<1x1x256xf32> to vector<1x256xf32>
    %c6_72 = arith.constant 6 : index
    %c0_73 = arith.constant 0 : index
    %c0_74 = arith.constant 0 : index
    %52 = vector.load %arg3[%c6_72, %c0_73, %c0_74] : memref<9x1x256xf32, #tpu.memory_space<vmem>>, vector<1x1x256xf32>
    %53 = vector.shape_cast %52 : vector<1x1x256xf32> to vector<1x256xf32>
    %c7_75 = arith.constant 7 : index
    %c0_76 = arith.constant 0 : index
    %c0_77 = arith.constant 0 : index
    %54 = vector.load %arg3[%c7_75, %c0_76, %c0_77] : memref<9x1x256xf32, #tpu.memory_space<vmem>>, vector<1x1x256xf32>
    %55 = vector.shape_cast %54 : vector<1x1x256xf32> to vector<1x256xf32>
    %c8_78 = arith.constant 8 : index
    %c0_79 = arith.constant 0 : index
    %c0_80 = arith.constant 0 : index
    %56 = vector.load %arg3[%c8_78, %c0_79, %c0_80] : memref<9x1x256xf32, #tpu.memory_space<vmem>>, vector<1x1x256xf32>
    %57 = vector.shape_cast %56 : vector<1x1x256xf32> to vector<1x256xf32>
    %c0_81 = arith.constant 0 : index
    %c0_82 = arith.constant 0 : index
    %c0_83 = arith.constant 0 : index
    %58 = vector.load %arg1[%c0_81, %c0_82, %c0_83] : memref<1x32x256xbf16, #tpu.memory_space<vmem>>, vector<1x32x256xbf16>
    %59 = vector.shape_cast %58 : vector<1x32x256xbf16> to vector<32x256xbf16>
    %60 = arith.extf %59 : vector<32x256xbf16> to vector<32x256xf32>
    %cst = arith.constant dense<0.000000e+00> : vector<2x256xf32>
    %61 = tpu.matmul %0, %60, %cst {dimension_numbers = #tpu.dot_dimension_numbers<[1], [0], [0], [1], [0, 0, 1, 1], [], []>} : vector<2x32xf32>, vector<32x256xf32>, vector<2x256xf32> -> vector<2x256xf32>
    %62 = vector.broadcast %1 : vector<2x1xf32> to vector<2x256xf32>
    %63 = arith.addf %61, %62 : vector<2x256xf32>
    %cst_84 = arith.constant 0.000000e+00 : f32
    %64 = vector.broadcast %cst_84 : f32 to vector<2x256xf32>
    %65 = arith.maximumf %63, %64 : vector<2x256xf32>
    %66 = vector.extract_strided_slice %15 {offsets = [0, 0], sizes = [2, 1], strides = [1, 1]} : vector<2x2xf32> to vector<2x1xf32>
    %67 = vector.extract_strided_slice %65 {offsets = [0, 0], sizes = [1, 256], strides = [1, 1]} : vector<2x256xf32> to vector<1x256xf32>
    %68 = vector.broadcast %66 : vector<2x1xf32> to vector<2x256xf32>
    %69 = vector.broadcast %67 : vector<1x256xf32> to vector<2x256xf32>
    %70 = arith.mulf %68, %69 : vector<2x256xf32>
    %71 = vector.extract_strided_slice %15 {offsets = [0, 1], sizes = [2, 1], strides = [1, 1]} : vector<2x2xf32> to vector<2x1xf32>
    %72 = vector.extract_strided_slice %65 {offsets = [1, 0], sizes = [1, 256], strides = [1, 1]} : vector<2x256xf32> to vector<1x256xf32>
    %73 = vector.broadcast %71 : vector<2x1xf32> to vector<2x256xf32>
    %74 = vector.broadcast %72 : vector<1x256xf32> to vector<2x256xf32>
    %75 = arith.mulf %73, %74 : vector<2x256xf32>
    %76 = arith.addf %70, %75 : vector<2x256xf32>
    %c68_i32 = arith.constant 68 : i32
    %77 = tpu.dynamic_rotate %65 by %c68_i32 dim 1 : vector<2x256xf32>, i32 -> vector<2x256xf32>
    %78 = vector.broadcast %43 : vector<1x256xf32> to vector<2x256xf32>
    %79 = arith.mulf %77, %78 : vector<2x256xf32>
    %80 = vector.extract_strided_slice %7 {offsets = [0, 0], sizes = [2, 1], strides = [1, 1]} : vector<2x2xf32> to vector<2x1xf32>
    %81 = vector.extract_strided_slice %79 {offsets = [0, 0], sizes = [1, 256], strides = [1, 1]} : vector<2x256xf32> to vector<1x256xf32>
    %82 = vector.broadcast %80 : vector<2x1xf32> to vector<2x256xf32>
    %83 = vector.broadcast %81 : vector<1x256xf32> to vector<2x256xf32>
    %84 = arith.mulf %82, %83 : vector<2x256xf32>
    %85 = vector.extract_strided_slice %7 {offsets = [0, 1], sizes = [2, 1], strides = [1, 1]} : vector<2x2xf32> to vector<2x1xf32>
    %86 = vector.extract_strided_slice %79 {offsets = [1, 0], sizes = [1, 256], strides = [1, 1]} : vector<2x256xf32> to vector<1x256xf32>
    %87 = vector.broadcast %85 : vector<2x1xf32> to vector<2x256xf32>
    %88 = vector.broadcast %86 : vector<1x256xf32> to vector<2x256xf32>
    %89 = arith.mulf %87, %88 : vector<2x256xf32>
    %90 = arith.addf %84, %89 : vector<2x256xf32>
    %91 = arith.addf %76, %90 : vector<2x256xf32>
    %c64_i32 = arith.constant 64 : i32
    %92 = tpu.dynamic_rotate %65 by %c64_i32 dim 1 : vector<2x256xf32>, i32 -> vector<2x256xf32>
    %93 = vector.broadcast %45 : vector<1x256xf32> to vector<2x256xf32>
    %94 = arith.mulf %92, %93 : vector<2x256xf32>
    %95 = vector.extract_strided_slice %9 {offsets = [0, 0], sizes = [2, 1], strides = [1, 1]} : vector<2x2xf32> to vector<2x1xf32>
    %96 = vector.extract_strided_slice %94 {offsets = [0, 0], sizes = [1, 256], strides = [1, 1]} : vector<2x256xf32> to vector<1x256xf32>
    %97 = vector.broadcast %95 : vector<2x1xf32> to vector<2x256xf32>
    %98 = vector.broadcast %96 : vector<1x256xf32> to vector<2x256xf32>
    %99 = arith.mulf %97, %98 : vector<2x256xf32>
    %100 = vector.extract_strided_slice %9 {offsets = [0, 1], sizes = [2, 1], strides = [1, 1]} : vector<2x2xf32> to vector<2x1xf32>
    %101 = vector.extract_strided_slice %94 {offsets = [1, 0], sizes = [1, 256], strides = [1, 1]} : vector<2x256xf32> to vector<1x256xf32>
    %102 = vector.broadcast %100 : vector<2x1xf32> to vector<2x256xf32>
    %103 = vector.broadcast %101 : vector<1x256xf32> to vector<2x256xf32>
    %104 = arith.mulf %102, %103 : vector<2x256xf32>
    %105 = arith.addf %99, %104 : vector<2x256xf32>
    %106 = arith.addf %91, %105 : vector<2x256xf32>
    %c60_i32 = arith.constant 60 : i32
    %107 = tpu.dynamic_rotate %65 by %c60_i32 dim 1 : vector<2x256xf32>, i32 -> vector<2x256xf32>
    %108 = vector.broadcast %47 : vector<1x256xf32> to vector<2x256xf32>
    %109 = arith.mulf %107, %108 : vector<2x256xf32>
    %110 = vector.extract_strided_slice %11 {offsets = [0, 0], sizes = [2, 1], strides = [1, 1]} : vector<2x2xf32> to vector<2x1xf32>
    %111 = vector.extract_strided_slice %109 {offsets = [0, 0], sizes = [1, 256], strides = [1, 1]} : vector<2x256xf32> to vector<1x256xf32>
    %112 = vector.broadcast %110 : vector<2x1xf32> to vector<2x256xf32>
    %113 = vector.broadcast %111 : vector<1x256xf32> to vector<2x256xf32>
    %114 = arith.mulf %112, %113 : vector<2x256xf32>
    %115 = vector.extract_strided_slice %11 {offsets = [0, 1], sizes = [2, 1], strides = [1, 1]} : vector<2x2xf32> to vector<2x1xf32>
    %116 = vector.extract_strided_slice %109 {offsets = [1, 0], sizes = [1, 256], strides = [1, 1]} : vector<2x256xf32> to vector<1x256xf32>
    %117 = vector.broadcast %115 : vector<2x1xf32> to vector<2x256xf32>
    %118 = vector.broadcast %116 : vector<1x256xf32> to vector<2x256xf32>
    %119 = arith.mulf %117, %118 : vector<2x256xf32>
    %120 = arith.addf %114, %119 : vector<2x256xf32>
    %121 = arith.addf %106, %120 : vector<2x256xf32>
    %c4_i32 = arith.constant 4 : i32
    %122 = tpu.dynamic_rotate %65 by %c4_i32 dim 1 : vector<2x256xf32>, i32 -> vector<2x256xf32>
    %123 = vector.broadcast %49 : vector<1x256xf32> to vector<2x256xf32>
    %124 = arith.mulf %122, %123 : vector<2x256xf32>
    %125 = vector.extract_strided_slice %13 {offsets = [0, 0], sizes = [2, 1], strides = [1, 1]} : vector<2x2xf32> to vector<2x1xf32>
    %126 = vector.extract_strided_slice %124 {offsets = [0, 0], sizes = [1, 256], strides = [1, 1]} : vector<2x256xf32> to vector<1x256xf32>
    %127 = vector.broadcast %125 : vector<2x1xf32> to vector<2x256xf32>
    %128 = vector.broadcast %126 : vector<1x256xf32> to vector<2x256xf32>
    %129 = arith.mulf %127, %128 : vector<2x256xf32>
    %130 = vector.extract_strided_slice %13 {offsets = [0, 1], sizes = [2, 1], strides = [1, 1]} : vector<2x2xf32> to vector<2x1xf32>
    %131 = vector.extract_strided_slice %124 {offsets = [1, 0], sizes = [1, 256], strides = [1, 1]} : vector<2x256xf32> to vector<1x256xf32>
    %132 = vector.broadcast %130 : vector<2x1xf32> to vector<2x256xf32>
    %133 = vector.broadcast %131 : vector<1x256xf32> to vector<2x256xf32>
    %134 = arith.mulf %132, %133 : vector<2x256xf32>
    %135 = arith.addf %129, %134 : vector<2x256xf32>
    %136 = arith.addf %121, %135 : vector<2x256xf32>
    %c252_i32 = arith.constant 252 : i32
    %137 = tpu.dynamic_rotate %65 by %c252_i32 dim 1 : vector<2x256xf32>, i32 -> vector<2x256xf32>
    %138 = vector.broadcast %51 : vector<1x256xf32> to vector<2x256xf32>
    %139 = arith.mulf %137, %138 : vector<2x256xf32>
    %140 = vector.extract_strided_slice %17 {offsets = [0, 0], sizes = [2, 1], strides = [1, 1]} : vector<2x2xf32> to vector<2x1xf32>
    %141 = vector.extract_strided_slice %139 {offsets = [0, 0], sizes = [1, 256], strides = [1, 1]} : vector<2x256xf32> to vector<1x256xf32>
    %142 = vector.broadcast %140 : vector<2x1xf32> to vector<2x256xf32>
    %143 = vector.broadcast %141 : vector<1x256xf32> to vector<2x256xf32>
    %144 = arith.mulf %142, %143 : vector<2x256xf32>
    %145 = vector.extract_strided_slice %17 {offsets = [0, 1], sizes = [2, 1], strides = [1, 1]} : vector<2x2xf32> to vector<2x1xf32>
    %146 = vector.extract_strided_slice %139 {offsets = [1, 0], sizes = [1, 256], strides = [1, 1]} : vector<2x256xf32> to vector<1x256xf32>
    %147 = vector.broadcast %145 : vector<2x1xf32> to vector<2x256xf32>
    %148 = vector.broadcast %146 : vector<1x256xf32> to vector<2x256xf32>
    %149 = arith.mulf %147, %148 : vector<2x256xf32>
    %150 = arith.addf %144, %149 : vector<2x256xf32>
    %151 = arith.addf %136, %150 : vector<2x256xf32>
    %c196_i32 = arith.constant 196 : i32
    %152 = tpu.dynamic_rotate %65 by %c196_i32 dim 1 : vector<2x256xf32>, i32 -> vector<2x256xf32>
    %153 = vector.broadcast %53 : vector<1x256xf32> to vector<2x256xf32>
    %154 = arith.mulf %152, %153 : vector<2x256xf32>
    %155 = vector.extract_strided_slice %19 {offsets = [0, 0], sizes = [2, 1], strides = [1, 1]} : vector<2x2xf32> to vector<2x1xf32>
    %156 = vector.extract_strided_slice %154 {offsets = [0, 0], sizes = [1, 256], strides = [1, 1]} : vector<2x256xf32> to vector<1x256xf32>
    %157 = vector.broadcast %155 : vector<2x1xf32> to vector<2x256xf32>
    %158 = vector.broadcast %156 : vector<1x256xf32> to vector<2x256xf32>
    %159 = arith.mulf %157, %158 : vector<2x256xf32>
    %160 = vector.extract_strided_slice %19 {offsets = [0, 1], sizes = [2, 1], strides = [1, 1]} : vector<2x2xf32> to vector<2x1xf32>
    %161 = vector.extract_strided_slice %154 {offsets = [1, 0], sizes = [1, 256], strides = [1, 1]} : vector<2x256xf32> to vector<1x256xf32>
    %162 = vector.broadcast %160 : vector<2x1xf32> to vector<2x256xf32>
    %163 = vector.broadcast %161 : vector<1x256xf32> to vector<2x256xf32>
    %164 = arith.mulf %162, %163 : vector<2x256xf32>
    %165 = arith.addf %159, %164 : vector<2x256xf32>
    %166 = arith.addf %151, %165 : vector<2x256xf32>
    %c192_i32 = arith.constant 192 : i32
    %167 = tpu.dynamic_rotate %65 by %c192_i32 dim 1 : vector<2x256xf32>, i32 -> vector<2x256xf32>
    %168 = vector.broadcast %55 : vector<1x256xf32> to vector<2x256xf32>
    %169 = arith.mulf %167, %168 : vector<2x256xf32>
    %170 = vector.extract_strided_slice %21 {offsets = [0, 0], sizes = [2, 1], strides = [1, 1]} : vector<2x2xf32> to vector<2x1xf32>
    %171 = vector.extract_strided_slice %169 {offsets = [0, 0], sizes = [1, 256], strides = [1, 1]} : vector<2x256xf32> to vector<1x256xf32>
    %172 = vector.broadcast %170 : vector<2x1xf32> to vector<2x256xf32>
    %173 = vector.broadcast %171 : vector<1x256xf32> to vector<2x256xf32>
    %174 = arith.mulf %172, %173 : vector<2x256xf32>
    %175 = vector.extract_strided_slice %21 {offsets = [0, 1], sizes = [2, 1], strides = [1, 1]} : vector<2x2xf32> to vector<2x1xf32>
    %176 = vector.extract_strided_slice %169 {offsets = [1, 0], sizes = [1, 256], strides = [1, 1]} : vector<2x256xf32> to vector<1x256xf32>
    %177 = vector.broadcast %175 : vector<2x1xf32> to vector<2x256xf32>
    %178 = vector.broadcast %176 : vector<1x256xf32> to vector<2x256xf32>
    %179 = arith.mulf %177, %178 : vector<2x256xf32>
    %180 = arith.addf %174, %179 : vector<2x256xf32>
    %181 = arith.addf %166, %180 : vector<2x256xf32>
    %c188_i32 = arith.constant 188 : i32
    %182 = tpu.dynamic_rotate %65 by %c188_i32 dim 1 : vector<2x256xf32>, i32 -> vector<2x256xf32>
    %183 = vector.broadcast %57 : vector<1x256xf32> to vector<2x256xf32>
    %184 = arith.mulf %182, %183 : vector<2x256xf32>
    %185 = vector.extract_strided_slice %23 {offsets = [0, 0], sizes = [2, 1], strides = [1, 1]} : vector<2x2xf32> to vector<2x1xf32>
    %186 = vector.extract_strided_slice %184 {offsets = [0, 0], sizes = [1, 256], strides = [1, 1]} : vector<2x256xf32> to vector<1x256xf32>
    %187 = vector.broadcast %185 : vector<2x1xf32> to vector<2x256xf32>
    %188 = vector.broadcast %186 : vector<1x256xf32> to vector<2x256xf32>
    %189 = arith.mulf %187, %188 : vector<2x256xf32>
    %190 = vector.extract_strided_slice %23 {offsets = [0, 1], sizes = [2, 1], strides = [1, 1]} : vector<2x2xf32> to vector<2x1xf32>
    %191 = vector.extract_strided_slice %184 {offsets = [1, 0], sizes = [1, 256], strides = [1, 1]} : vector<2x256xf32> to vector<1x256xf32>
    %192 = vector.broadcast %190 : vector<2x1xf32> to vector<2x256xf32>
    %193 = vector.broadcast %191 : vector<1x256xf32> to vector<2x256xf32>
    %194 = arith.mulf %192, %193 : vector<2x256xf32>
    %195 = arith.addf %189, %194 : vector<2x256xf32>
    %196 = arith.addf %181, %195 : vector<2x256xf32>
    %197 = vector.broadcast %4 : vector<2x1xf32> to vector<2x256xf32>
    %198 = arith.addf %196, %197 : vector<2x256xf32>
    %cst_85 = arith.constant 0.000000e+00 : f32
    %199 = vector.broadcast %cst_85 : f32 to vector<2x256xf32>
    %200 = arith.maximumf %198, %199 : vector<2x256xf32>
    %201 = vector.extract_strided_slice %33 {offsets = [0, 0], sizes = [2, 1], strides = [1, 1]} : vector<2x2xf32> to vector<2x1xf32>
    %202 = vector.extract_strided_slice %200 {offsets = [0, 0], sizes = [1, 256], strides = [1, 1]} : vector<2x256xf32> to vector<1x256xf32>
    %203 = vector.broadcast %201 : vector<2x1xf32> to vector<2x256xf32>
    %204 = vector.broadcast %202 : vector<1x256xf32> to vector<2x256xf32>
    %205 = arith.mulf %203, %204 : vector<2x256xf32>
    %206 = vector.extract_strided_slice %33 {offsets = [0, 1], sizes = [2, 1], strides = [1, 1]} : vector<2x2xf32> to vector<2x1xf32>
    %207 = vector.extract_strided_slice %200 {offsets = [1, 0], sizes = [1, 256], strides = [1, 1]} : vector<2x256xf32> to vector<1x256xf32>
    %208 = vector.broadcast %206 : vector<2x1xf32> to vector<2x256xf32>
    %209 = vector.broadcast %207 : vector<1x256xf32> to vector<2x256xf32>
    %210 = arith.mulf %208, %209 : vector<2x256xf32>
    %211 = arith.addf %205, %210 : vector<2x256xf32>
    %c68_i32_86 = arith.constant 68 : i32
    %212 = tpu.dynamic_rotate %200 by %c68_i32_86 dim 1 : vector<2x256xf32>, i32 -> vector<2x256xf32>
    %213 = vector.broadcast %43 : vector<1x256xf32> to vector<2x256xf32>
    %214 = arith.mulf %212, %213 : vector<2x256xf32>
    %215 = vector.extract_strided_slice %25 {offsets = [0, 0], sizes = [2, 1], strides = [1, 1]} : vector<2x2xf32> to vector<2x1xf32>
    %216 = vector.extract_strided_slice %214 {offsets = [0, 0], sizes = [1, 256], strides = [1, 1]} : vector<2x256xf32> to vector<1x256xf32>
    %217 = vector.broadcast %215 : vector<2x1xf32> to vector<2x256xf32>
    %218 = vector.broadcast %216 : vector<1x256xf32> to vector<2x256xf32>
    %219 = arith.mulf %217, %218 : vector<2x256xf32>
    %220 = vector.extract_strided_slice %25 {offsets = [0, 1], sizes = [2, 1], strides = [1, 1]} : vector<2x2xf32> to vector<2x1xf32>
    %221 = vector.extract_strided_slice %214 {offsets = [1, 0], sizes = [1, 256], strides = [1, 1]} : vector<2x256xf32> to vector<1x256xf32>
    %222 = vector.broadcast %220 : vector<2x1xf32> to vector<2x256xf32>
    %223 = vector.broadcast %221 : vector<1x256xf32> to vector<2x256xf32>
    %224 = arith.mulf %222, %223 : vector<2x256xf32>
    %225 = arith.addf %219, %224 : vector<2x256xf32>
    %226 = arith.addf %211, %225 : vector<2x256xf32>
    %c64_i32_87 = arith.constant 64 : i32
    %227 = tpu.dynamic_rotate %200 by %c64_i32_87 dim 1 : vector<2x256xf32>, i32 -> vector<2x256xf32>
    %228 = vector.broadcast %45 : vector<1x256xf32> to vector<2x256xf32>
    %229 = arith.mulf %227, %228 : vector<2x256xf32>
    %230 = vector.extract_strided_slice %27 {offsets = [0, 0], sizes = [2, 1], strides = [1, 1]} : vector<2x2xf32> to vector<2x1xf32>
    %231 = vector.extract_strided_slice %229 {offsets = [0, 0], sizes = [1, 256], strides = [1, 1]} : vector<2x256xf32> to vector<1x256xf32>
    %232 = vector.broadcast %230 : vector<2x1xf32> to vector<2x256xf32>
    %233 = vector.broadcast %231 : vector<1x256xf32> to vector<2x256xf32>
    %234 = arith.mulf %232, %233 : vector<2x256xf32>
    %235 = vector.extract_strided_slice %27 {offsets = [0, 1], sizes = [2, 1], strides = [1, 1]} : vector<2x2xf32> to vector<2x1xf32>
    %236 = vector.extract_strided_slice %229 {offsets = [1, 0], sizes = [1, 256], strides = [1, 1]} : vector<2x256xf32> to vector<1x256xf32>
    %237 = vector.broadcast %235 : vector<2x1xf32> to vector<2x256xf32>
    %238 = vector.broadcast %236 : vector<1x256xf32> to vector<2x256xf32>
    %239 = arith.mulf %237, %238 : vector<2x256xf32>
    %240 = arith.addf %234, %239 : vector<2x256xf32>
    %241 = arith.addf %226, %240 : vector<2x256xf32>
    %c60_i32_88 = arith.constant 60 : i32
    %242 = tpu.dynamic_rotate %200 by %c60_i32_88 dim 1 : vector<2x256xf32>, i32 -> vector<2x256xf32>
    %243 = vector.broadcast %47 : vector<1x256xf32> to vector<2x256xf32>
    %244 = arith.mulf %242, %243 : vector<2x256xf32>
    %245 = vector.extract_strided_slice %29 {offsets = [0, 0], sizes = [2, 1], strides = [1, 1]} : vector<2x2xf32> to vector<2x1xf32>
    %246 = vector.extract_strided_slice %244 {offsets = [0, 0], sizes = [1, 256], strides = [1, 1]} : vector<2x256xf32> to vector<1x256xf32>
    %247 = vector.broadcast %245 : vector<2x1xf32> to vector<2x256xf32>
    %248 = vector.broadcast %246 : vector<1x256xf32> to vector<2x256xf32>
    %249 = arith.mulf %247, %248 : vector<2x256xf32>
    %250 = vector.extract_strided_slice %29 {offsets = [0, 1], sizes = [2, 1], strides = [1, 1]} : vector<2x2xf32> to vector<2x1xf32>
    %251 = vector.extract_strided_slice %244 {offsets = [1, 0], sizes = [1, 256], strides = [1, 1]} : vector<2x256xf32> to vector<1x256xf32>
    %252 = vector.broadcast %250 : vector<2x1xf32> to vector<2x256xf32>
    %253 = vector.broadcast %251 : vector<1x256xf32> to vector<2x256xf32>
    %254 = arith.mulf %252, %253 : vector<2x256xf32>
    %255 = arith.addf %249, %254 : vector<2x256xf32>
    %256 = arith.addf %241, %255 : vector<2x256xf32>
    %c4_i32_89 = arith.constant 4 : i32
    %257 = tpu.dynamic_rotate %200 by %c4_i32_89 dim 1 : vector<2x256xf32>, i32 -> vector<2x256xf32>
    %258 = vector.broadcast %49 : vector<1x256xf32> to vector<2x256xf32>
    %259 = arith.mulf %257, %258 : vector<2x256xf32>
    %260 = vector.extract_strided_slice %31 {offsets = [0, 0], sizes = [2, 1], strides = [1, 1]} : vector<2x2xf32> to vector<2x1xf32>
    %261 = vector.extract_strided_slice %259 {offsets = [0, 0], sizes = [1, 256], strides = [1, 1]} : vector<2x256xf32> to vector<1x256xf32>
    %262 = vector.broadcast %260 : vector<2x1xf32> to vector<2x256xf32>
    %263 = vector.broadcast %261 : vector<1x256xf32> to vector<2x256xf32>
    %264 = arith.mulf %262, %263 : vector<2x256xf32>
    %265 = vector.extract_strided_slice %31 {offsets = [0, 1], sizes = [2, 1], strides = [1, 1]} : vector<2x2xf32> to vector<2x1xf32>
    %266 = vector.extract_strided_slice %259 {offsets = [1, 0], sizes = [1, 256], strides = [1, 1]} : vector<2x256xf32> to vector<1x256xf32>
    %267 = vector.broadcast %265 : vector<2x1xf32> to vector<2x256xf32>
    %268 = vector.broadcast %266 : vector<1x256xf32> to vector<2x256xf32>
    %269 = arith.mulf %267, %268 : vector<2x256xf32>
    %270 = arith.addf %264, %269 : vector<2x256xf32>
    %271 = arith.addf %256, %270 : vector<2x256xf32>
    %c252_i32_90 = arith.constant 252 : i32
    %272 = tpu.dynamic_rotate %200 by %c252_i32_90 dim 1 : vector<2x256xf32>, i32 -> vector<2x256xf32>
    %273 = vector.broadcast %51 : vector<1x256xf32> to vector<2x256xf32>
    %274 = arith.mulf %272, %273 : vector<2x256xf32>
    %275 = vector.extract_strided_slice %35 {offsets = [0, 0], sizes = [2, 1], strides = [1, 1]} : vector<2x2xf32> to vector<2x1xf32>
    %276 = vector.extract_strided_slice %274 {offsets = [0, 0], sizes = [1, 256], strides = [1, 1]} : vector<2x256xf32> to vector<1x256xf32>
    %277 = vector.broadcast %275 : vector<2x1xf32> to vector<2x256xf32>
    %278 = vector.broadcast %276 : vector<1x256xf32> to vector<2x256xf32>
    %279 = arith.mulf %277, %278 : vector<2x256xf32>
    %280 = vector.extract_strided_slice %35 {offsets = [0, 1], sizes = [2, 1], strides = [1, 1]} : vector<2x2xf32> to vector<2x1xf32>
    %281 = vector.extract_strided_slice %274 {offsets = [1, 0], sizes = [1, 256], strides = [1, 1]} : vector<2x256xf32> to vector<1x256xf32>
    %282 = vector.broadcast %280 : vector<2x1xf32> to vector<2x256xf32>
    %283 = vector.broadcast %281 : vector<1x256xf32> to vector<2x256xf32>
    %284 = arith.mulf %282, %283 : vector<2x256xf32>
    %285 = arith.addf %279, %284 : vector<2x256xf32>
    %286 = arith.addf %271, %285 : vector<2x256xf32>
    %c196_i32_91 = arith.constant 196 : i32
    %287 = tpu.dynamic_rotate %200 by %c196_i32_91 dim 1 : vector<2x256xf32>, i32 -> vector<2x256xf32>
    %288 = vector.broadcast %53 : vector<1x256xf32> to vector<2x256xf32>
    %289 = arith.mulf %287, %288 : vector<2x256xf32>
    %290 = vector.extract_strided_slice %37 {offsets = [0, 0], sizes = [2, 1], strides = [1, 1]} : vector<2x2xf32> to vector<2x1xf32>
    %291 = vector.extract_strided_slice %289 {offsets = [0, 0], sizes = [1, 256], strides = [1, 1]} : vector<2x256xf32> to vector<1x256xf32>
    %292 = vector.broadcast %290 : vector<2x1xf32> to vector<2x256xf32>
    %293 = vector.broadcast %291 : vector<1x256xf32> to vector<2x256xf32>
    %294 = arith.mulf %292, %293 : vector<2x256xf32>
    %295 = vector.extract_strided_slice %37 {offsets = [0, 1], sizes = [2, 1], strides = [1, 1]} : vector<2x2xf32> to vector<2x1xf32>
    %296 = vector.extract_strided_slice %289 {offsets = [1, 0], sizes = [1, 256], strides = [1, 1]} : vector<2x256xf32> to vector<1x256xf32>
    %297 = vector.broadcast %295 : vector<2x1xf32> to vector<2x256xf32>
    %298 = vector.broadcast %296 : vector<1x256xf32> to vector<2x256xf32>
    %299 = arith.mulf %297, %298 : vector<2x256xf32>
    %300 = arith.addf %294, %299 : vector<2x256xf32>
    %301 = arith.addf %286, %300 : vector<2x256xf32>
    %c192_i32_92 = arith.constant 192 : i32
    %302 = tpu.dynamic_rotate %200 by %c192_i32_92 dim 1 : vector<2x256xf32>, i32 -> vector<2x256xf32>
    %303 = vector.broadcast %55 : vector<1x256xf32> to vector<2x256xf32>
    %304 = arith.mulf %302, %303 : vector<2x256xf32>
    %305 = vector.extract_strided_slice %39 {offsets = [0, 0], sizes = [2, 1], strides = [1, 1]} : vector<2x2xf32> to vector<2x1xf32>
    %306 = vector.extract_strided_slice %304 {offsets = [0, 0], sizes = [1, 256], strides = [1, 1]} : vector<2x256xf32> to vector<1x256xf32>
    %307 = vector.broadcast %305 : vector<2x1xf32> to vector<2x256xf32>
    %308 = vector.broadcast %306 : vector<1x256xf32> to vector<2x256xf32>
    %309 = arith.mulf %307, %308 : vector<2x256xf32>
    %310 = vector.extract_strided_slice %39 {offsets = [0, 1], sizes = [2, 1], strides = [1, 1]} : vector<2x2xf32> to vector<2x1xf32>
    %311 = vector.extract_strided_slice %304 {offsets = [1, 0], sizes = [1, 256], strides = [1, 1]} : vector<2x256xf32> to vector<1x256xf32>
    %312 = vector.broadcast %310 : vector<2x1xf32> to vector<2x256xf32>
    %313 = vector.broadcast %311 : vector<1x256xf32> to vector<2x256xf32>
    %314 = arith.mulf %312, %313 : vector<2x256xf32>
    %315 = arith.addf %309, %314 : vector<2x256xf32>
    %316 = arith.addf %301, %315 : vector<2x256xf32>
    %c188_i32_93 = arith.constant 188 : i32
    %317 = tpu.dynamic_rotate %200 by %c188_i32_93 dim 1 : vector<2x256xf32>, i32 -> vector<2x256xf32>
    %318 = vector.broadcast %57 : vector<1x256xf32> to vector<2x256xf32>
    %319 = arith.mulf %317, %318 : vector<2x256xf32>
    %320 = vector.extract_strided_slice %41 {offsets = [0, 0], sizes = [2, 1], strides = [1, 1]} : vector<2x2xf32> to vector<2x1xf32>
    %321 = vector.extract_strided_slice %319 {offsets = [0, 0], sizes = [1, 256], strides = [1, 1]} : vector<2x256xf32> to vector<1x256xf32>
    %322 = vector.broadcast %320 : vector<2x1xf32> to vector<2x256xf32>
    %323 = vector.broadcast %321 : vector<1x256xf32> to vector<2x256xf32>
    %324 = arith.mulf %322, %323 : vector<2x256xf32>
    %325 = vector.extract_strided_slice %41 {offsets = [0, 1], sizes = [2, 1], strides = [1, 1]} : vector<2x2xf32> to vector<2x1xf32>
    %326 = vector.extract_strided_slice %319 {offsets = [1, 0], sizes = [1, 256], strides = [1, 1]} : vector<2x256xf32> to vector<1x256xf32>
    %327 = vector.broadcast %325 : vector<2x1xf32> to vector<2x256xf32>
    %328 = vector.broadcast %326 : vector<1x256xf32> to vector<2x256xf32>
    %329 = arith.mulf %327, %328 : vector<2x256xf32>
    %330 = arith.addf %324, %329 : vector<2x256xf32>
    %331 = arith.addf %316, %330 : vector<2x256xf32>
    %332 = vector.broadcast %5 : vector<2x1xf32> to vector<2x256xf32>
    %333 = arith.addf %331, %332 : vector<2x256xf32>
    %cst_94 = arith.constant 0.000000e+00 : f32
    %334 = vector.broadcast %cst_94 : f32 to vector<2x256xf32>
    %335 = arith.maximumf %333, %334 : vector<2x256xf32>
    %336 = vector.broadcast %2 : vector<2x1xf32> to vector<2x256xf32>
    %337 = arith.mulf %335, %336 : vector<2x256xf32>
    %cst_95 = arith.constant dense<0.000000e+00> : vector<256xf32>
    %338 = vector.multi_reduction <add>, %337, %cst_95 [0] : vector<2x256xf32> to vector<256xf32>
    %339 = vector.shape_cast %338 : vector<256xf32> to vector<1x256xf32>
    %340 = vector.broadcast %3 : vector<1x1xf32> to vector<1x256xf32>
    %341 = arith.addf %339, %340 : vector<1x256xf32>
    %c0_96 = arith.constant 0 : index
    %c0_97 = arith.constant 0 : index
    %c0_98 = arith.constant 0 : index
    %342 = vector.load %arg2[%c0_96, %c0_97, %c0_98] : memref<1x32x1xf32, #tpu.memory_space<vmem>>, vector<1x32x1xf32>
    %343 = vector.shape_cast %342 : vector<1x32x1xf32> to vector<32x1xf32>
    %344 = vector.broadcast %343 : vector<32x1xf32> to vector<32x256xf32>
    %345 = vector.broadcast %341 : vector<1x256xf32> to vector<32x256xf32>
    %346 = arith.addf %344, %345 : vector<32x256xf32>
    %347 = arith.negf %346 : vector<32x256xf32>
    %348 = math.exp %347 : vector<32x256xf32>
    %cst_99 = arith.constant 1.000000e+00 : f32
    %349 = vector.broadcast %cst_99 : f32 to vector<32x256xf32>
    %350 = arith.addf %349, %348 : vector<32x256xf32>
    %351 = arith.divf %349, %350 : vector<32x256xf32>
    %cst_100 = arith.constant 1.000000e+00 : f32
    %352 = vector.broadcast %cst_100 : f32 to vector<32x256xf32>
    %353 = arith.addf %352, %351 : vector<32x256xf32>
    %354 = arith.mulf %353, %60 : vector<32x256xf32>
    %355 = arith.truncf %354 : vector<32x256xf32> to vector<32x256xbf16>
    %c0_101 = arith.constant 0 : index
    %c0_102 = arith.constant 0 : index
    %c0_103 = arith.constant 0 : index
    %356 = vector.load %arg12[%c0_101, %c0_102, %c0_103] : memref<1x32x256xbf16, #tpu.memory_space<vmem>>, vector<1x32x256xbf16>
    %357 = vector.shape_cast %356 : vector<1x32x256xbf16> to vector<32x256xbf16>
    %358 = vector.shape_cast %355 : vector<32x256xbf16> to vector<1x32x256xbf16>
    tpu.vector_store %arg12[%c0_101, %c0_102, %c0_103], %358 {strides = array<i32>} : memref<1x32x256xbf16, #tpu.memory_space<vmem>>, vector<1x32x256xbf16>,
    return
  }
  func.func @transform_0(%arg0: i32) -> (i32, i32, i32) {
    %c0_i32 = arith.constant 0 : i32
    %c0_i32_0 = arith.constant 0 : i32
    %c0_i32_1 = arith.constant 0 : i32
    return %arg0, %c0_i32, %c0_i32_0 : i32, i32, i32
  }
  func.func @transform_1(%arg0: i32) -> (i32, i32, i32) {
    %c0_i32 = arith.constant 0 : i32
    %c0_i32_0 = arith.constant 0 : i32
    %c0_i32_1 = arith.constant 0 : i32
    return %arg0, %c0_i32, %c0_i32_0 : i32, i32, i32
  }
  func.func @transform_2(%arg0: i32) -> (i32, i32, i32) {
    %c0_i32 = arith.constant 0 : i32
    %c0_i32_0 = arith.constant 0 : i32
    %c0_i32_1 = arith.constant 0 : i32
    %c0_i32_2 = arith.constant 0 : i32
    return %c0_i32, %c0_i32_0, %c0_i32_1 : i32, i32, i32
  }
  func.func @transform_3(%arg0: i32) -> (i32, i32) {
    %c0_i32 = arith.constant 0 : i32
    %c0_i32_0 = arith.constant 0 : i32
    %c0_i32_1 = arith.constant 0 : i32
    return %c0_i32, %c0_i32_0 : i32, i32
  }
  func.func @transform_4(%arg0: i32) -> (i32, i32) {
    %c0_i32 = arith.constant 0 : i32
    %c0_i32_0 = arith.constant 0 : i32
    %c0_i32_1 = arith.constant 0 : i32
    return %c0_i32, %c0_i32_0 : i32, i32
  }
  func.func @transform_5(%arg0: i32) -> (i32, i32, i32) {
    %c0_i32 = arith.constant 0 : i32
    %c0_i32_0 = arith.constant 0 : i32
    %c0_i32_1 = arith.constant 0 : i32
    %c0_i32_2 = arith.constant 0 : i32
    return %c0_i32, %c0_i32_0, %c0_i32_1 : i32, i32, i32
  }
  func.func @transform_6(%arg0: i32) -> (i32, i32) {
    %c0_i32 = arith.constant 0 : i32
    %c0_i32_0 = arith.constant 0 : i32
    %c0_i32_1 = arith.constant 0 : i32
    return %c0_i32, %c0_i32_0 : i32, i32
  }
  func.func @transform_7(%arg0: i32) -> (i32, i32, i32) {
    %c0_i32 = arith.constant 0 : i32
    %c0_i32_0 = arith.constant 0 : i32
    %c0_i32_1 = arith.constant 0 : i32
    %c0_i32_2 = arith.constant 0 : i32
    return %c0_i32, %c0_i32_0, %c0_i32_1 : i32, i32, i32
  }
  func.func @transform_8(%arg0: i32) -> (i32, i32) {
    %c0_i32 = arith.constant 0 : i32
    %c0_i32_0 = arith.constant 0 : i32
    %c0_i32_1 = arith.constant 0 : i32
    return %c0_i32, %c0_i32_0 : i32, i32
  }
  func.func @transform_9(%arg0: i32) -> (i32, i32) {
    %c0_i32 = arith.constant 0 : i32
    %c0_i32_0 = arith.constant 0 : i32
    %c0_i32_1 = arith.constant 0 : i32
    return %c0_i32, %c0_i32_0 : i32, i32
  }
  func.func @transform_10(%arg0: i32) -> (i32, i32) {
    %c0_i32 = arith.constant 0 : i32
    %c0_i32_0 = arith.constant 0 : i32
    %c0_i32_1 = arith.constant 0 : i32
    return %c0_i32, %c0_i32_0 : i32, i32
  }
  func.func @transform_11(%arg0: i32) -> (i32, i32, i32) {
    %c0_i32 = arith.constant 0 : i32
    %c0_i32_0 = arith.constant 0 : i32
    %c0_i32_1 = arith.constant 0 : i32
    return %arg0, %c0_i32, %c0_i32_0 : i32, i32, i32
  }
}

</mosaic_0001>

<bundles_post_ra>
// kernel: bam_forward.1
= control target key start
LH: loop header
LB: loop body
LE: loop exit
PB: predicated region body
PF: predicated region fallthrough
CT: control target
= control target key end

     0   :  { %s1795_s19 = smov 0   ;;  %s2334_s0 = inlined_call_operand.vmem [shape: bf16[2,32,256], index: 0, kind: input, shape index: {}]   ;;  %s2335_s1 = inlined_call_operand.vmem [shape: f32[2,32,1], index: 1, kind: input, shape index: {}]   ;;  %s2336_s2 = inlined_call_operand.vmem [shape: f32[9,1,256], index: 2, kind: input, shape index: {}]   ;;  %s2337_s3 = inlined_call_operand.vmem [shape: f32[2,32], index: 3, kind: input, shape index: {}]   ;;  %s2338_s4 = inlined_call_operand.vmem [shape: f32[2,1], index: 4, kind: input, shape index: {}]   ;;  %s2339_s5 = inlined_call_operand.vmem [shape: f32[9,2,2], index: 5, kind: input, shape index: {}]   ;;  %s2340_s6 = inlined_call_operand.vmem [shape: f32[2,1], index: 6, kind: input, shape index: {}]   ;;  %s2341_s7 = inlined_call_operand.vmem [shape: f32[9,2,2], index: 7, kind: input, shape index: {}]   ;;  %s2342_s8 = inlined_call_operand.vmem [shape: f32[2,1], index: 8, kind: input, shape index: {}]   ;;  %s2343_s9 = inlined_call_operand.vmem [shape: f32[2,1], index: 9, kind: input, shape index: {}]   ;;  %s2344_s10 = inlined_call_operand.<no memory space> [shape: f32[1,1], index: 10, kind: input, shape index: {}]   ;;  %s2345_s11 = inlined_call_operand.vmem [shape: bf16[2,32,256], index: 11, kind: output, shape index: {}]  }
   0x1   :  { %v16_v0 = vstv %s2344_s10 }
   0x2   :  { %17 = vst [vmem:[#allocation2] sm:$0x1] %v16_v0 }
   0x3 LB: > { %s1577_s20 = sadd.s32 4294967295, %s1722_s19   ;;  %p1581_p0 = scmp.ge.s32.totalorder %s1722_s19, 1  ;;  %s1722_s19 = sphi %s1795_s19, %s23_s19  }
   0x4   : > { %p349_p1 = scmp.lt.s32.totalorder %s1722_s19, 3 }
   0x6   : > { %p350_p2 = pnand %p1581_p0, %p349_p1 }
   0x7   : > { %p394_p3 = scmp.lt.s32.totalorder (!%p350_p2), %s1577_s20, 1  ;;  %v1724_v1 = vmov (!%p350_p2), 0.0   ;;  %v1725_v2 = vmov (!%p350_p2), 0   ;;  %v410_v3 = vld [vmem:[%s2338_s4] sm:$0x3] (!%p350_p2)  ;;  %v1726_v5 = vmov (!%p350_p2), 1   ;;  %v563_v54 = vlaneseq (!%p350_p2) }
   0x8   : > { %353 = sbr.rel (%p350_p2) target bundleno = 643 (0x283), region = 64  ;;  %549 = vmatprep.mubr.f32.mxu0 (!%p350_p2), %v1724_v1  ;;  %1661 = vset.pattern.permute.xlu0 (!%p350_p2), %v1725_v2  ;;  %v1591_v4 = vld [vmem:[%s2339_s5 + $0x8] sm:$0x3] (!%p350_p2)  ;;  %v415_v6 = vld [vmem:[%s2339_s5] sm:$0x3] (!%p350_p2)  ;;  %vm481_vm0 = vcmask (!%p350_p2), 261120  }
   0x9   : > { %478 = vperm.xlu0 (!%p350_p2), %1661, %v410_v3   ;;  %1662 = vset.pattern.permute.xlu1 (!%p350_p2), %v1726_v5  ;;  %v1588_v11 = vld [vmem:[%s2339_s5 + $0x2] sm:$0x3] (!%p350_p2)  ;;  %v1590_v16 = vld [vmem:[%s2339_s5 + $0x6] sm:$0x3] (!%p350_p2)  ;;  %v409_v17 = vld [vmem:[%s2337_s3] sm:$0x3] (!%p350_p2) }
   0xa   : > { %574 = vperm.xlu1 (!%p350_p2), %1662, %v1591_v4   ;;  %v1593_v18 = vld [vmem:[%s2339_s5 + $0xc] sm:$0x3] (!%p350_p2)  ;;  %v1589_v19 = vld [vmem:[%s2339_s5 + $0x4] sm:$0x3] (!%p350_p2)  ;;  %v1592_v20 = vld [vmem:[%s2339_s5 + $0xa] sm:$0x3] (!%p350_p2) }
   0xb   : > { %v1594_v21 = vld [vmem:[%s2339_s5 + $0xe] sm:$0x3] (!%p350_p2)  ;;  %s1727_s26 = smov (!%p350_p2), 68   ;;  %s1728_s28 = smov (!%p350_p2), 64   ;;  %v413_v29 = vld [vmem:[%s2340_s6] sm:$0x3] (!%p350_p2) }
   0xc   : > { %s1729_s29 = smov (!%p350_p2), 4   ;;  %s1730_s30 = smov (!%p350_p2), 60   ;;  %v432_v30 = vld [vmem:[%s2341_s7] sm:$0x3] (!%p350_p2)  ;;  %v1596_v31 = vld [vmem:[%s2341_s7 + $0x2] sm:$0x3] (!%p350_p2) }
   0xd   : > { %560 = vperm.xlu0 (!%p350_p2), %1661, %v1591_v4   ;;  %s1731_s16 = smov (!%p350_p2), 124   ;;  %v1597_v32 = vld [vmem:[%s2341_s7 + $0x4] sm:$0x3] (!%p350_p2)  ;;  %v1595_v33 = vld [vmem:[%s2339_s5 + $0x10] sm:$0x3] (!%p350_p2)  ;;  %v564_v57 = vshrl.u32 (!%p350_p2), %v563_v54, 7 }
   0xe   : > { %1663 = vset.pattern.permute.xlu1 (!%p350_p2), %v1725_v2  ;;  %v1598_v34 = vld [vmem:[%s2341_s7 + $0x6] sm:$0x3] (!%p350_p2)  ;;  %v1600_v35 = vld [vmem:[%s2341_s7 + $0xa] sm:$0x3] (!%p350_p2)  ;;  %v1601_v36 = vld [vmem:[%s2341_s7 + $0xc] sm:$0x3] (!%p350_p2) }
   0xf   : > { %s2347_s20 = smov (!%p394_p3, %s1577_s20), 1  ;;  %613 = vperm.xlu1 %1663, %v415_v6   ;;  %v1599_v37 = vld [vmem:[%s2341_s7 + $0x8] sm:$0x3]  ;;  %v1602_v38 = vld [vmem:[%s2341_s7 + $0xe] sm:$0x3]  ;;  %v1937_v59 = vsub.s32 0, %v564_v57 }
  0x10   : > { %s1811_s24 = sshll.u32 %s2347_s20, 5  ;;  %v1939_v60 = vand.u32 127, %v563_v54  ;;  %v449_v62 = vld [vmem:[%s2336_s2] sm:$0x3]  ;;  %v1946_v63 = vsub.s32 1, %v564_v57  ;;  %vm1360_vm6 = vcmask 1041408  }
  0x11   : > { %s1817_s27 = scalar_lea.vmem %s2334_s0, %s1811_s24  ;;  %666 = vperm.xlu0 %1661, %v1588_v11   ;;  %v1952_v1 = vrot.slane %v449_v62, %v1937_v59  ;;  %s403_s17 = scalar_lea.vmem %s2335_s1, %s1811_s24 }
  0x12   : > { %v464_v7 = vld [vmem:[%s1817_s27] sm:$0xff]  ;;  %v465_v8 = vld [vmem:[%s1817_s27 + $0x8] sm:$0xff]  ;;  %v466_v9 = vld [vmem:[%s1817_s27 + $0x10] sm:$0xff]  ;;  %vm595_vm1 = vcmp.lt.s32.totalorder %v1939_v60, 68  ;;  %v1955_v3 = vrot.slane %v449_v62, %v1946_v63  ;;  %vm648_vm2 = vcmp.lt.s32.totalorder %v1939_v60, 64  ;;  %vm754_vm3 = vcmp.lt.s32.totalorder %v1939_v60, 4  ;;  %s408_s20 = scalar_lea.vmem %s2345_s11, %s1811_s24 }
  0x13   : > { %v467_v10 = vld [vmem:[%s1817_s27 + $0x18] sm:$0xff]  ;;  %v1641_v12 = vcombine.high %v464_v7, %v465_v8  ;;  %v1642_v13 = vcombine.low %v464_v7, %v465_v8  ;;  %1664 = vset.pattern.permute.xlu1 %v1726_v5  ;;  %v1604_v8 = vld [vmem:[%s2336_s2 + $0x2] sm:$0x3]  ;;  %vm701_vm4 = vcmp.lt.s32.totalorder %v1939_v60, 60  ;;  %vm807_vm5 = vcmp.lt.s32.totalorder %v1939_v60, 124 }
  0x14   : > { %v1643_v14 = vcombine.high %v466_v9, %v467_v10  ;;  %v1644_v15 = vcombine.low %v466_v9, %v467_v10  ;;  %680 = vperm.xlu1 %1664, %v1588_v11   ;;  %v1609_v9 = vld [vmem:[%s2336_s2 + $0xe] sm:$0x3] }
  0x15   : > { %1634 = vmatprep.subr.bf16.mxu0 %v1641_v12  ;;  %772 = vperm.xlu0 %1661, %v1590_v16  }
  0x16   : > { %1636 = vmatpush1.bf16.msra.mxu0 %v1642_v13 }
  0x17   : > { %1638 = vmatprep.subr.bf16.mxu0 %v1643_v14 }
  0x18   : > { %1665 = vset.pattern.permute.xlu1 %v1725_v2 }
  0x19   : > { %871 = vperm.xlu0 %1661, %v1593_v18   ;;  %719 = vperm.xlu1 %1665, %v1589_v19  }
  0x1a   : > { %1640 = vmatpush1.bf16.msra.mxu0 %v1644_v15 }
  0x1d   : > { %1611 = vmatmul.mubr.msk.f32.vlgmr.msra.gmra.mrb[0].mxu0 %vm481_vm0, %v409_v17  ;;  %1668 = vset.pattern.permute.xlu0 %v1726_v5  ;;  %v1988_v17 = vrot.slane %v1604_v8, %v1946_v63 }
  0x1e   : > { %627 = vperm.xlu0 %1668, %v415_v6   ;;  %1666 = vset.pattern.permute.xlu1 %v1726_v5 }
  0x1f   : > { %786 = vperm.xlu1 %1666, %v1590_v16   ;;  %v1985_v16 = vrot.slane %v1604_v8, %v1937_v59 }
  0x22   : > { %733 = vperm.xlu0 %1668, %v1589_v19   ;;  %v1994_v19 = vrot.slane %v1609_v9, %v1946_v63 }
  0x23   : > { %1667 = vset.pattern.permute.xlu1 %v1725_v2 }
  0x24   : > { %825 = vperm.xlu1 %1667, %v1592_v20  }
  0x26   : > { %839 = vperm.xlu0 %1668, %v1592_v20  }
  0x28   : > { %1669 = vset.pattern.permute.xlu1 %v1726_v5 }
  0x29   : > { %885 = vperm.xlu1 %1669, %v1593_v18   ;;  %v1991_v18 = vrot.slane %v1609_v9, %v1937_v59 }
  0x2d   : > { %1670 = vset.pattern.permute.xlu1 %v1725_v2 }
  0x2e   : > { %917 = vperm.xlu1 %1670, %v1594_v21  }
  0x88   : > { %v479_v22 = vpop.permute.xlu0 %478 }
  0x89   : > { %v575_v39 = vpop.permute.xlu1 %574 }
  0x8c   : > { %v561_v45 = vpop.permute.xlu0 %560 }
  0x8e   : > { %v1913_v40 = vpop.permute.xlu1 %613 }
  0x90   : > { %v1925_v47 = vpop.permute.xlu0 %666 }
  0x93   : > { %v1915_v41 = vpop.permute.xlu1 %680 }
  0x94   : > { %v1929_v49 = vpop.permute.xlu0 %772 }
  0x98   : > { %v1917_v42 = vpop.permute.xlu1 %719  ;;  %v1931_v51 = vpop.permute.xlu0 %871 }
  0x9d   : > { %v1933_v53 = vpop.permute.xlu0 %627 }
  0x9e   : > { %v1919_v43 = vpop.permute.xlu1 %786 }
  0xa1   : > { %v1935_v56 = vpop.permute.xlu0 %733 }
  0xa3   : > { %v1921_v44 = vpop.permute.xlu1 %825 }
  0xa5   : > { %v1948_v0 = vpop.permute.xlu0 %839 }
  0xa8   : > { %v1923_v46 = vpop.permute.xlu1 %885 }
  0xad   : > { %v1927_v48 = vpop.permute.xlu1 %917 }
  0xf0   : > { %v551_v23 = vpop.f32.mrb[0].mxu0 }
  0xf1   : > { %v552_v24 = vadd.f32 %v551_v23, %v479_v22  ;;  %v553_v25 = vpop.f32.mrb[1].mxu0  ;;  %v1606_v23 = vld [vmem:[%s2336_s2 + $0x6] sm:$0x3] }
  0xf2   : > { %v554_v26 = vadd.f32 %v553_v25, %v479_v22 }
  0xf3   : > { %v1855_v27 = vmax.f32 %v552_v24, 0.0  ;;  %v1605_v24 = vld [vmem:[%s2336_s2 + $0x4] sm:$0x3] }
  0xf4   : > { %v1857_v28 = vmax.f32 %v554_v26, 0.0 }
  0xf5   : > { %589 = vrot.lane.b32.xlu1 %v1855_v27, %s1727_s26  ;;  %v566_v4 = vrot.slane %v1855_v27, %v1937_v59  ;;  %v580_v7 = vrot.slane %v1855_v27, %v1946_v63 }
  0xf6   : > { %646 = vrot.lane.b32.xlu0 %v1857_v28, %s1728_s28  ;;  %v570_v6 = vrot.slane %v1857_v28, %v1937_v59  ;;  %v584_v12 = vrot.slane %v1857_v28, %v1946_v63 }
  0xf7   : > { %v571_v20 = vmul.f32 %v566_v4, %v561_v45  ;;  %v585_v22 = vmul.f32 %v580_v7, %v575_v39 }
  0xf8   : > { %v586_v25 = vmul.f32 %v584_v12, %v575_v39 }
  0xf9   : > { %644 = vrot.lane.b32.xlu1 %v1855_v27, %s1728_s28  ;;  %v587_v54 = vadd.f32 %v585_v22, %v571_v20 }
  0xfa   : > { %752 = vrot.lane.b32.xlu0 %v1857_v28, %s1729_s29 }
  0xfd   : > { %697 = vrot.lane.b32.xlu1 %v1855_v27, %s1730_s30 }
  0xfe   : > { %931 = vperm.xlu0 %1668, %v1594_v21   ;;  %v572_v21 = vmul.f32 %v570_v6, %v561_v45  ;;  %v1608_v45 = vld [vmem:[%s2336_s2 + $0xc] sm:$0x3] }
  0xff   : > { %v2049_v9 = vrot.slane %v1608_v45, %v1937_v59  ;;  %v2052_v12 = vrot.slane %v1608_v45, %v1946_v63 }
 0x100   : > { %v588_v57 = vadd.f32 %v586_v25, %v572_v21 }
 0x101   : > { %750 = vrot.lane.b32.xlu1 %v1855_v27, %s1729_s29 }
 0x102   : > { %1672 = vset.pattern.permute.xlu0 %v1725_v2 }
 0x103   : > { %996 = vperm.xlu0 %1672, %v413_v29  }
 0x105   : > { %803 = vrot.lane.b32.xlu1 %v1855_v27, %s1731_s16 }
 0x107   : > { %1044 = vperm.xlu0 %1672, %v432_v30  }
 0x109   : > { %591 = vrot.lane.b32.xlu1 %v1857_v28, %s1727_s26 }
 0x10b   : > { %1085 = vperm.xlu0 %1672, %v1596_v31  }
 0x10d   : > { %699 = vrot.lane.b32.xlu1 %v1857_v28, %s1730_s30 }
 0x10f   : > { %1126 = vperm.xlu0 %1672, %v1597_v32  }
 0x111   : > { %963 = vperm.xlu1 %1670, %v1595_v33  }
 0x113   : > { %1167 = vperm.xlu0 %1672, %v1598_v34  }
 0x115   : > { %805 = vrot.lane.b32.xlu1 %v1857_v28, %s1731_s16 }
 0x116   : > { %1671 = vset.pattern.permute.xlu1 %v1726_v5 }
 0x117   : > { %1208 = vperm.xlu0 %1672, %v1600_v35  }
 0x119   : > { %977 = vperm.xlu1 %1671, %v1595_v33   ;;  %v2013_v33 = vrot.slane %v1606_v23, %v1937_v59 }
 0x11b   : > { %1243 = vperm.xlu0 %1672, %v1601_v36  }
 0x11d   : > { %1673 = vset.pattern.permute.xlu1 %v1725_v2 }
 0x11e   : > { %1005 = vperm.xlu1 %1673, %v1599_v37  }
 0x11f   : > { %1278 = vperm.xlu0 %1672, %v1602_v38  }
 0x122   : > { %1674 = vset.pattern.permute.xlu1 %v1726_v5 }
 0x123   : > { %1019 = vperm.xlu1 %1674, %v1599_v37  }
 0x127   : > { %1058 = vperm.xlu1 %1674, %v432_v30  }
 0x12b   : > { %1099 = vperm.xlu1 %1674, %v1596_v31  }
 0x12f   : > { %1140 = vperm.xlu1 %1674, %v1597_v32  }
 0x133   : > { %1181 = vperm.xlu1 %1674, %v1598_v34   ;;  %v2016_v34 = vrot.slane %v1606_v23, %v1946_v63 }
 0x137   : > { %1222 = vperm.xlu1 %1674, %v1600_v35   ;;  %v2019_v35 = vrot.slane %v1605_v24, %v1937_v59 }
 0x13b   : > { %1257 = vperm.xlu1 %1674, %v1601_v36   ;;  %v2022_v36 = vrot.slane %v1605_v24, %v1946_v63 }
 0x13f   : > { %1292 = vperm.xlu1 %1674, %v1602_v38  }
 0x167   : > { %v590_v50 = vpop.permute.xlu1 %589 }
 0x168   : > { %v647_v13 = vpop.permute.xlu0 %646 }
 0x16b   : > { %v645_v52 = vpop.permute.xlu1 %644 }
 0x16c   : > { %v649_v26 = vsel %vm648_vm2, %v645_v52, %v647_v13  ;;  %v650_v27 = vsel %vm648_vm2, %v647_v13, %v645_v52  ;;  %v753_v39 = vpop.permute.xlu0 %752 }
 0x16d   : > { %v662_v37 = vmul.f32 %v1985_v16, %v650_v27  ;;  %v663_v38 = vmul.f32 %v1988_v17, %v649_v26 }
 0x16f   : > { %v698_v55 = vpop.permute.xlu1 %697  ;;  %v686_v21 = vrot.slane %v662_v37, %v1946_v63  ;;  %v690_v22 = vrot.slane %v663_v38, %v1946_v63 }
 0x173   : > { %v751_v58 = vpop.permute.xlu1 %750 }
 0x174   : > { %v755_v62 = vsel %vm754_vm3, %v751_v58, %v753_v39  ;;  %v756_v4 = vsel %vm754_vm3, %v753_v39, %v751_v58 }
 0x175   : > { %v768_v23 = vmul.f32 %v2013_v33, %v756_v4  ;;  %v769_v24 = vmul.f32 %v2016_v34, %v755_v62  ;;  %v913_v62 = vmul.f32 %v1991_v18, %v649_v26  ;;  %v914_v4 = vmul.f32 %v1994_v19, %v650_v27 }
 0x177   : > { %v1941_v61 = vpop.permute.xlu1 %803 }
 0x17b   : > { %v592_v5 = vpop.permute.xlu1 %591 }
 0x17c   : > { %v1971_v10 = vsel %vm595_vm1, %v590_v50, %v592_v5  ;;  %v1975_v11 = vsel %vm595_vm1, %v592_v5, %v590_v50  ;;  %v1610_v5 = vld [vmem:[%s2336_s2 + $0x10] sm:$0x3] }
 0x17d   : > { %v609_v14 = vmul.f32 %v1952_v1, %v1975_v11  ;;  %v610_v15 = vmul.f32 %v1955_v3, %v1971_v10  ;;  %v2067_v20 = vrot.slane %v1610_v5, %v1946_v63 }
 0x17f   : > { %v700_v28 = vpop.permute.xlu1 %699  ;;  %v619_v29 = vrot.slane %v609_v14, %v1937_v59  ;;  %v623_v30 = vrot.slane %v610_v15, %v1937_v59  ;;  %v633_v31 = vrot.slane %v609_v14, %v1946_v63  ;;  %v637_v32 = vrot.slane %v610_v15, %v1946_v63 }
 0x180   : > { %v2031_v50 = vsel %vm701_vm4, %v698_v55, %v700_v28  ;;  %v2035_v52 = vsel %vm701_vm4, %v700_v28, %v698_v55  ;;  %v672_v14 = vrot.slane %v662_v37, %v1937_v59  ;;  %v2064_v15 = vrot.slane %v1610_v5, %v1937_v59 }
 0x181   : > { %v624_v6 = vmul.f32 %v619_v29, %v1913_v40  ;;  %v625_v7 = vmul.f32 %v623_v30, %v1913_v40  ;;  %v638_v8 = vmul.f32 %v633_v31, %v1933_v53  ;;  %v639_v55 = vmul.f32 %v637_v32, %v1933_v53  ;;  %v1607_v40 = vld [vmem:[%s2336_s2 + $0xa] sm:$0x3] }
 0x182   : > { %v715_v58 = vmul.f32 %v2019_v35, %v2035_v52  ;;  %v716_v13 = vmul.f32 %v2022_v36, %v2031_v50  ;;  %v676_v53 = vrot.slane %v663_v38, %v1937_v59  ;;  %v2075_v29 = vrot.slane %v1607_v40, %v1937_v59 }
 0x183   : > { %v640_v25 = vadd.f32 %v638_v8, %v624_v6  ;;  %v641_v28 = vadd.f32 %v639_v55, %v625_v7  ;;  %v2078_v30 = vrot.slane %v1607_v40, %v1946_v63  ;;  %v677_v39 = vmul.f32 %v672_v14, %v1925_v47 }
 0x184   : > { %v725_v31 = vrot.slane %v715_v58, %v1937_v59  ;;  %v729_v32 = vrot.slane %v716_v13, %v1937_v59  ;;  %v739_v37 = vrot.slane %v715_v58, %v1946_v63  ;;  %v743_v38 = vrot.slane %v716_v13, %v1946_v63 }
 0x185   : > { %v678_v45 = vmul.f32 %v676_v53, %v1925_v47  ;;  %v691_v5 = vmul.f32 %v686_v21, %v1915_v41  ;;  %v692_v6 = vmul.f32 %v690_v22, %v1915_v41  ;;  %v778_v7 = vrot.slane %v768_v23, %v1937_v59 }
 0x186   : > { %v782_v8 = vrot.slane %v769_v24, %v1937_v59  ;;  %v792_v55 = vrot.slane %v768_v23, %v1946_v63  ;;  %v796_v58 = vrot.slane %v769_v24, %v1946_v63  ;;  %v642_v13 = vadd.f32 %v640_v25, %v587_v54 }
 0x187   : > { %v643_v40 = vadd.f32 %v641_v28, %v588_v57  ;;  %v730_v47 = vmul.f32 %v725_v31, %v1917_v42  ;;  %v731_v26 = vmul.f32 %v729_v32, %v1917_v42  ;;  %v744_v27 = vmul.f32 %v739_v37, %v1935_v56 }
 0x188   : > { %v745_v14 = vmul.f32 %v743_v38, %v1935_v56  ;;  %v923_v41 = vrot.slane %v913_v62, %v1937_v59  ;;  %v927_v53 = vrot.slane %v914_v4, %v1937_v59  ;;  %v867_v21 = vmul.f32 %v2049_v9, %v1971_v10 }
 0x189   : > { %v868_v22 = vmul.f32 %v2052_v12, %v1975_v11  ;;  %v693_v57 = vadd.f32 %v691_v5, %v677_v39  ;;  %v694_v23 = vadd.f32 %v692_v6, %v678_v45  ;;  %v937_v42 = vrot.slane %v913_v62, %v1946_v63 }
 0x18a   : > { %v941_v24 = vrot.slane %v914_v4, %v1946_v63  ;;  %v783_v56 = vmul.f32 %v778_v7, %v1929_v49  ;;  %v784_v25 = vmul.f32 %v782_v8, %v1929_v49  ;;  %v797_v28 = vmul.f32 %v792_v55, %v1919_v43 }
 0x18b   : > { %v798_v31 = vmul.f32 %v796_v58, %v1919_v43  ;;  %v696_v10 = vadd.f32 %v694_v23, %v643_v40  ;;  %v695_v32 = vadd.f32 %v693_v57, %v642_v13  ;;  %v746_v37 = vadd.f32 %v744_v27, %v730_v47 }
 0x18c   : > { %v747_v11 = vadd.f32 %v745_v14, %v731_v26  ;;  %v877_v38 = vrot.slane %v867_v21, %v1937_v59  ;;  %v881_v39 = vrot.slane %v868_v22, %v1937_v59  ;;  %v928_v45 = vmul.f32 %v923_v41, %v1927_v48  ;;  %v932_v26 = vpop.permute.xlu0 %931 }
 0x18d   : > { %v929_v62 = vmul.f32 %v927_v53, %v1927_v48  ;;  %v891_v5 = vrot.slane %v867_v21, %v1946_v63  ;;  %v895_v49 = vrot.slane %v868_v22, %v1946_v63  ;;  %v799_v7 = vadd.f32 %v797_v28, %v783_v56 }
 0x18e   : > { %v800_v8 = vadd.f32 %v798_v31, %v784_v25  ;;  %v748_v48 = vadd.f32 %v746_v37, %v695_v32  ;;  %v749_v13 = vadd.f32 %v747_v11, %v696_v10  ;;  %v959_v40 = vmul.f32 %v2064_v15, %v2031_v50 }
 0x18f   : > { %v960_v47 = vmul.f32 %v2067_v20, %v2035_v52  ;;  %v882_v53 = vmul.f32 %v877_v38, %v1931_v51  ;;  %v883_v21 = vmul.f32 %v881_v39, %v1931_v51  ;;  %v896_v22 = vmul.f32 %v891_v5, %v1923_v46 }
 0x190   : > { %v2104_v54 = vpop.permute.xlu1 %963  ;;  %v897_v50 = vmul.f32 %v895_v49, %v1923_v46  ;;  %v942_v25 = vmul.f32 %v937_v42, %v932_v26  ;;  %v943_v28 = vmul.f32 %v941_v24, %v932_v26  ;;  %v983_v31 = vrot.slane %v959_v40, %v1946_v63 }
 0x191   : > { %v987_v10 = vrot.slane %v960_v47, %v1946_v63  ;;  %v802_v51 = vadd.f32 %v800_v8, %v749_v13  ;;  %v801_v37 = vadd.f32 %v799_v7, %v748_v48  ;;  %v898_v46 = vadd.f32 %v896_v22, %v882_v53  ;;  %v1386_v22 = vld [vmem:[%s403_s17] sm:$0xff] }
 0x192   : > { %v899_v39 = vadd.f32 %v897_v50, %v883_v21  ;;  %v944_v24 = vadd.f32 %v942_v25, %v928_v45  ;;  %v414_v45 = vld [vmem:[%s2342_s8] sm:$0x3]  ;;  %v1387_v50 = vld [vmem:[%s403_s17 + $0x8] sm:$0xff] }
 0x193   : > { %v412_v21 = vld [vmem:[#allocation2] sm:$0x1] }
 0x194   : > { %v806_v4 = vpop.permute.xlu1 %805 }
 0x195   : > { %v808_v43 = vsel %vm807_vm5, %v1941_v61, %v806_v4  ;;  %v809_v6 = vsel %vm807_vm5, %v806_v4, %v1941_v61  ;;  %v969_v4 = vrot.slane %v959_v40, %v1937_v59 }
 0x196   : > { %v821_v55 = vmul.f32 %v2075_v29, %v808_v43  ;;  %v822_v58 = vmul.f32 %v2078_v30, %v809_v6  ;;  %v945_v43 = vadd.f32 %v943_v28, %v929_v62  ;;  %v411_v62 = vld [vmem:[%s2343_s9] sm:$0x3] }
 0x197   : > { %v974_v6 = vmul.f32 %v969_v4, %v2104_v54 }
 0x198   : > { %v831_v27 = vrot.slane %v821_v55, %v1937_v59  ;;  %v835_v14 = vrot.slane %v822_v58, %v1937_v59  ;;  %v845_v61 = vrot.slane %v821_v55, %v1946_v63  ;;  %v849_v41 = vrot.slane %v822_v58, %v1946_v63  ;;  %v978_v32 = vpop.permute.xlu1 %977 }
 0x199   : > { %v989_v42 = vmul.f32 %v987_v10, %v978_v32 }
 0x19a   : > { %v836_v57 = vmul.f32 %v831_v27, %v1921_v44  ;;  %v837_v52 = vmul.f32 %v835_v14, %v1921_v44  ;;  %v850_v23 = vmul.f32 %v845_v61, %v1948_v0  ;;  %v851_v56 = vmul.f32 %v849_v41, %v1948_v0  ;;  %v997_v14 = vpop.permute.xlu0 %996 }
 0x19b   : > { %v973_v44 = vrot.slane %v960_v47, %v1937_v59  ;;  %v988_v0 = vmul.f32 %v983_v31, %v978_v32 }
 0x19c   : > { %v852_v11 = vadd.f32 %v850_v23, %v836_v57  ;;  %v853_v38 = vadd.f32 %v851_v56, %v837_v52  ;;  %v1388_v57 = vld [vmem:[%s403_s17 + $0x10] sm:$0xff]  ;;  %v1389_v52 = vld [vmem:[%s403_s17 + $0x18] sm:$0xff] }
 0x19d   : > { %v975_v55 = vmul.f32 %v973_v44, %v2104_v54  ;;  %v990_v13 = vadd.f32 %v988_v0, %v974_v6  ;;  %v1603_v54 = vld [vmem:[%s2341_s7 + $0x10] sm:$0x3]  ;;  %v1006_v23 = vpop.permute.xlu1 %1005 }
 0x19e   : > { %v854_v5 = vadd.f32 %v852_v11, %v801_v37  ;;  %v855_v49 = vadd.f32 %v853_v38, %v802_v51  ;;  %v1045_v25 = vpop.permute.xlu0 %1044 }
 0x19f   : > { %v991_v26 = vadd.f32 %v989_v42, %v975_v55 }
 0x1a0   : > { %v901_v8 = vadd.f32 %v899_v39, %v855_v49  ;;  %v900_v7 = vadd.f32 %v898_v46, %v854_v5 }
 0x1a2   : > { %v947_v58 = vadd.f32 %v945_v43, %v901_v8  ;;  %v946_v48 = vadd.f32 %v944_v24, %v900_v7  ;;  %v1020_v56 = vpop.permute.xlu1 %1019  ;;  %v2186_v31 = vpop.permute.xlu0 %1085 }
 0x1a4   : > { %v992_v27 = vadd.f32 %v990_v13, %v946_v48  ;;  %v993_v40 = vadd.f32 %v991_v26, %v947_v58 }
 0x1a6   : > { %v999_v47 = vadd.f32 %v997_v14, %v992_v27  ;;  %v1000_v61 = vadd.f32 %v997_v14, %v993_v40  ;;  %v1059_v28 = vpop.permute.xlu1 %1058 }
 0x1a8   : > { %v2148_v41 = vmax.f32 %v999_v47, 0.0  ;;  %v2150_v53 = vmax.f32 %v1000_v61, 0.0 }
 0x1aa   : > { %1036 = vrot.lane.b32.xlu1 %v2150_v53, %s1727_s26  ;;  %1034 = vrot.lane.b32.xlu0 %v2148_v41, %s1727_s26  ;;  %v2188_v10 = vpop.permute.xlu1 %1099  ;;  %v1015_v24 = vrot.slane %v2150_v53, %v1937_v59  ;;  %v1011_v43 = vrot.slane %v2148_v41, %v1937_v59  ;;  %v1029_v8 = vrot.slane %v2150_v53, %v1946_v63 }
 0x1ab   : > { %v1025_v7 = vrot.slane %v2148_v41, %v1946_v63 }
 0x1ae   : > { %1077 = vrot.lane.b32.xlu1 %v2150_v53, %s1728_s28  ;;  %1075 = vrot.lane.b32.xlu0 %v2148_v41, %s1728_s28  ;;  %v2192_v32 = vpop.permute.xlu1 %1140 }
 0x1b2   : > { %1118 = vrot.lane.b32.xlu1 %v2150_v53, %s1730_s30  ;;  %1116 = vrot.lane.b32.xlu0 %v2148_v41, %s1730_s30  ;;  %v2196_v37 = vpop.permute.xlu1 %1181 }
 0x1b6   : > { %1159 = vrot.lane.b32.xlu1 %v2150_v53, %s1729_s29  ;;  %1157 = vrot.lane.b32.xlu0 %v2148_v41, %s1729_s29  ;;  %v2200_v38 = vpop.permute.xlu1 %1222 }
 0x1ba   : > { %1200 = vrot.lane.b32.xlu1 %v2150_v53, %s1731_s16  ;;  %1198 = vrot.lane.b32.xlu0 %v2148_v41, %s1731_s16  ;;  %v1258_v39 = vpop.permute.xlu1 %1257  ;;  %v1017_v41 = vmul.f32 %v1015_v24, %v1006_v23 }
 0x1be   : > { %1327 = vperm.xlu1 %1674, %v1603_v54   ;;  %1313 = vperm.xlu0 %1672, %v1603_v54   ;;  %v2204_v44 = vpop.permute.xlu1 %1292  ;;  %v1016_v54 = vmul.f32 %v1011_v43, %v1006_v23 }
 0x1c2   : > { %1675 = vset.pattern.permute.xlu1 %v1725_v2  ;;  %1346 = vperm.xlu0 %1672, %v414_v45   ;;  %v2190_v2 = vpop.permute.xlu0 %1126  ;;  %v1030_v45 = vmul.f32 %v1025_v7, %v1020_v56 }
 0x1c3   : > { %1355 = vperm.xlu1 %1675, %v411_v62  }
 0x1c6   : > { %1377 = vperm.xlu0 %1672, %v412_v21   ;;  %v2194_v51 = vpop.permute.xlu0 %1167 }
 0x1c7   : > { %1392 = vperm.xlu1 %1675, %v1386_v22  }
 0x1ca   : > { %1397 = vperm.xlu0 %1672, %v1387_v50   ;;  %v2198_v11 = vpop.permute.xlu0 %1208 }
 0x1cb   : > { %1402 = vperm.xlu1 %1675, %v1388_v57  }
 0x1ce   : > { %1407 = vperm.xlu0 %1672, %v1389_v52   ;;  %v1244_v46 = vpop.permute.xlu0 %1243 }
 0x1d2   : > { %v2202_v4 = vpop.permute.xlu0 %1278 }
 0x21c   : > { %v1037_v5 = vpop.permute.xlu1 %1036  ;;  %v1035_v49 = vpop.permute.xlu0 %1034 }
 0x21d   : > { %v1038_v0 = vsel %vm595_vm1, %v1035_v49, %v1037_v5  ;;  %v1039_v42 = vsel %vm595_vm1, %v1037_v5, %v1035_v49 }
 0x21e   : > { %v1040_v6 = vmul.f32 %v1039_v42, %v1952_v1  ;;  %v1041_v55 = vmul.f32 %v1038_v0, %v1955_v3  ;;  %v1239_v58 = vmul.f32 %v1038_v0, %v2049_v9  ;;  %v1240_v48 = vmul.f32 %v1039_v42, %v2052_v12 }
 0x21f   : > { %v1031_v9 = vmul.f32 %v1029_v8, %v1020_v56 }
 0x220   : > { %v1050_v13 = vrot.slane %v1040_v6, %v1937_v59  ;;  %v1054_v26 = vrot.slane %v1041_v55, %v1937_v59  ;;  %v1064_v27 = vrot.slane %v1040_v6, %v1946_v63  ;;  %v1068_v1 = vrot.slane %v1041_v55, %v1946_v63  ;;  %v1078_v40 = vpop.permute.xlu1 %1077  ;;  %v1076_v3 = vpop.permute.xlu0 %1075 }
 0x221   : > { %v1249_v12 = vrot.slane %v1239_v58, %v1937_v59  ;;  %v1253_v62 = vrot.slane %v1240_v48, %v1937_v59  ;;  %v1079_v21 = vsel %vm648_vm2, %v1076_v3, %v1078_v40  ;;  %v1080_v22 = vsel %vm648_vm2, %v1078_v40, %v1076_v3 }
 0x222   : > { %v1055_v14 = vmul.f32 %v1050_v13, %v1045_v25  ;;  %v1056_v47 = vmul.f32 %v1054_v26, %v1045_v25  ;;  %v1069_v61 = vmul.f32 %v1064_v27, %v1059_v28  ;;  %v1070_v53 = vmul.f32 %v1068_v1, %v1059_v28 }
 0x223   : > { %v1263_v52 = vrot.slane %v1239_v58, %v1946_v63  ;;  %v1267_v25 = vrot.slane %v1240_v48, %v1946_v63  ;;  %v1081_v23 = vmul.f32 %v1080_v22, %v1985_v16  ;;  %v1082_v56 = vmul.f32 %v1079_v21, %v1988_v17 }
 0x224   : > { %v1119_v50 = vpop.permute.xlu1 %1118  ;;  %v1117_v57 = vpop.permute.xlu0 %1116  ;;  %v1071_v28 = vadd.f32 %v1069_v61, %v1055_v14  ;;  %v1072_v5 = vadd.f32 %v1070_v53, %v1056_v47  ;;  %v2237_v49 = vmul.f32 %v1079_v21, %v1991_v18  ;;  %v2240_v0 = vmul.f32 %v1080_v22, %v1994_v19 }
 0x225   : > { %v1091_v42 = vrot.slane %v1081_v23, %v1937_v59  ;;  %v1095_v24 = vrot.slane %v1082_v56, %v1937_v59  ;;  %v1105_v43 = vrot.slane %v1081_v23, %v1946_v63  ;;  %v1109_v6 = vrot.slane %v1082_v56, %v1946_v63 }
 0x226   : > { %v1032_v55 = vadd.f32 %v1030_v45, %v1016_v54  ;;  %v1033_v16 = vadd.f32 %v1031_v9, %v1017_v41  ;;  %v2246_v8 = vmul.f32 %v1249_v12, %v1244_v46  ;;  %v2248_v17 = vmul.f32 %v1253_v62, %v1244_v46 }
 0x227   : > { %v1096_v58 = vmul.f32 %v1091_v42, %v2186_v31  ;;  %v1097_v19 = vmul.f32 %v1095_v24, %v2186_v31  ;;  %v1110_v48 = vmul.f32 %v1105_v43, %v2188_v10  ;;  %v1111_v13 = vmul.f32 %v1109_v6, %v2188_v10 }
 0x228   : > { %v1160_v7 = vpop.permute.xlu1 %1159  ;;  %v1158_v18 = vpop.permute.xlu0 %1157  ;;  %v1073_v26 = vadd.f32 %v1071_v28, %v1032_v55  ;;  %v1074_v27 = vadd.f32 %v1072_v5, %v1033_v16  ;;  %v2254_v1 = vmul.f32 %v1263_v52, %v1258_v39  ;;  %v2256_v40 = vmul.f32 %v1267_v25, %v1258_v39 }
 0x229   : > { %v1284_v46 = vrot.slane %v2237_v49, %v1937_v59  ;;  %v1288_v3 = vrot.slane %v2240_v0, %v1937_v59  ;;  %v1120_v14 = vsel %vm701_vm4, %v1117_v57, %v1119_v50  ;;  %v1121_v31 = vsel %vm701_vm4, %v1119_v50, %v1117_v57 }
 0x22a   : > { %v1298_v10 = vrot.slane %v2237_v49, %v1946_v63  ;;  %v1302_v47 = vrot.slane %v2240_v0, %v1946_v63  ;;  %v1122_v39 = vmul.f32 %v1121_v31, %v2019_v35  ;;  %v1123_v61 = vmul.f32 %v1120_v14, %v2022_v36 }
 0x22b   : > { %v1112_v41 = vadd.f32 %v1110_v48, %v1096_v58  ;;  %v1113_v45 = vadd.f32 %v1111_v13, %v1097_v19  ;;  %v1161_v9 = vsel %vm754_vm3, %v1158_v18, %v1160_v7  ;;  %v1162_v12 = vsel %vm754_vm3, %v1160_v7, %v1158_v18 }
 0x22c   : > { %v1201_v53 = vpop.permute.xlu1 %1200  ;;  %v1199_v54 = vpop.permute.xlu0 %1198  ;;  %v1132_v62 = vrot.slane %v1122_v39, %v1937_v59  ;;  %v1136_v21 = vrot.slane %v1123_v61, %v1937_v59  ;;  %v1146_v22 = vrot.slane %v1122_v39, %v1946_v63  ;;  %v1150_v35 = vrot.slane %v1123_v61, %v1946_v63 }
 0x22d   : > { %v1163_v36 = vmul.f32 %v1162_v12, %v2013_v33  ;;  %v1164_v50 = vmul.f32 %v1161_v9, %v2016_v34  ;;  %v1202_v57 = vsel %vm807_vm5, %v1199_v54, %v1201_v53  ;;  %v1203_v52 = vsel %vm807_vm5, %v1201_v53, %v1199_v54 }
 0x22e   : > { %v1137_v25 = vmul.f32 %v1132_v62, %v2190_v2  ;;  %v1138_v23 = vmul.f32 %v1136_v21, %v2190_v2  ;;  %v1151_v56 = vmul.f32 %v1146_v22, %v2192_v32  ;;  %v1152_v28 = vmul.f32 %v1150_v35, %v2192_v32 }
 0x22f   : > { %v1173_v5 = vrot.slane %v1163_v36, %v1937_v59  ;;  %v1177_v33 = vrot.slane %v1164_v50, %v1937_v59  ;;  %v1187_v34 = vrot.slane %v1163_v36, %v1946_v63  ;;  %v1191_v49 = vrot.slane %v1164_v50, %v1946_v63 }
 0x230   : > { %v1153_v0 = vadd.f32 %v1151_v56, %v1137_v25  ;;  %v1154_v42 = vadd.f32 %v1152_v28, %v1138_v23  ;;  %v1204_v60 = vmul.f32 %v1202_v57, %v2075_v29  ;;  %v1205_v24 = vmul.f32 %v1203_v52, %v2078_v30 }
 0x231   : > { %v1178_v2 = vmul.f32 %v1173_v5, %v2194_v51  ;;  %v1179_v43 = vmul.f32 %v1177_v33, %v2194_v51  ;;  %v1192_v32 = vmul.f32 %v1187_v34, %v2196_v37  ;;  %v1193_v6 = vmul.f32 %v1191_v49, %v2196_v37 }
 0x232   : > { %v1114_v55 = vadd.f32 %v1112_v41, %v1073_v26  ;;  %v1115_v16 = vadd.f32 %v1113_v45, %v1074_v27  ;;  %v1214_v7 = vrot.slane %v1204_v60, %v1937_v59  ;;  %v1218_v18 = vrot.slane %v1205_v24, %v1937_v59 }
 0x233   : > { %v1194_v58 = vadd.f32 %v1192_v32, %v1178_v2  ;;  %v1195_v19 = vadd.f32 %v1193_v6, %v1179_v43  ;;  %v1228_v29 = vrot.slane %v1204_v60, %v1946_v63  ;;  %v1232_v30 = vrot.slane %v1205_v24, %v1946_v63 }
 0x234   : > { %v1289_v48 = vmul.f32 %v1284_v46, %v2202_v4  ;;  %v1290_v51 = vmul.f32 %v1288_v3, %v2202_v4  ;;  %v1219_v13 = vmul.f32 %v1214_v7, %v2198_v11  ;;  %v1220_v37 = vmul.f32 %v1218_v18, %v2198_v11 }
 0x235   : > { %v1155_v26 = vadd.f32 %v1153_v0, %v1114_v55  ;;  %v1156_v27 = vadd.f32 %v1154_v42, %v1115_v16  ;;  %v1233_v39 = vmul.f32 %v1228_v29, %v2200_v38  ;;  %v1234_v61 = vmul.f32 %v1232_v30, %v2200_v38 }
 0x236   : > { %v1303_v53 = vmul.f32 %v1298_v10, %v2204_v44  ;;  %v1304_v54 = vmul.f32 %v1302_v47, %v2204_v44  ;;  %v1309_v41 = vmul.f32 %v1120_v14, %v2064_v15  ;;  %v1310_v46 = vmul.f32 %v1121_v31, %v2067_v20 }
 0x237   : > { %v1196_v45 = vadd.f32 %v1194_v58, %v1155_v26  ;;  %v1197_v4 = vadd.f32 %v1195_v19, %v1156_v27  ;;  %v1235_v3 = vadd.f32 %v1233_v39, %v1219_v13  ;;  %v1236_v9 = vadd.f32 %v1234_v61, %v1220_v37 }
 0x238   : > { %v1270_v11 = vadd.f32 %v2254_v1, %v2246_v8  ;;  %v1271_v12 = vadd.f32 %v2256_v40, %v2248_v17  ;;  %v1333_v10 = vrot.slane %v1309_v41, %v1946_v63  ;;  %v1337_v44 = vrot.slane %v1310_v46, %v1946_v63 }
 0x239   : > { %v1238_v62 = vadd.f32 %v1236_v9, %v1197_v4  ;;  %v1237_v38 = vadd.f32 %v1235_v3, %v1196_v45  ;;  %v1319_v15 = vrot.slane %v1309_v41, %v1937_v59  ;;  %v1323_v20 = vrot.slane %v1310_v46, %v1937_v59 }
 0x23a   : > { %v1305_v21 = vadd.f32 %v1303_v53, %v1289_v48  ;;  %v1306_v22 = vadd.f32 %v1304_v54, %v1290_v51 }
 0x23b   : > { %v1273_v47 = vadd.f32 %v1271_v12, %v1238_v62  ;;  %v1272_v35 = vadd.f32 %v1270_v11, %v1237_v38 }
 0x23d   : > { %v1328_v14 = vpop.permute.xlu1 %1327  ;;  %v1314_v31 = vpop.permute.xlu0 %1313  ;;  %v1308_v57 = vadd.f32 %v1306_v22, %v1273_v47  ;;  %v1307_v52 = vadd.f32 %v1305_v21, %v1272_v35 }
 0x23e   : > { %v1338_v8 = vmul.f32 %v1333_v10, %v1328_v14  ;;  %v1339_v1 = vmul.f32 %v1337_v44, %v1328_v14  ;;  %v1324_v36 = vmul.f32 %v1319_v15, %v1314_v31  ;;  %v1325_v17 = vmul.f32 %v1323_v20, %v1314_v31 }
 0x240   : > { %v1340_v40 = vadd.f32 %v1338_v8, %v1324_v36  ;;  %v1341_v50 = vadd.f32 %v1339_v1, %v1325_v17 }
 0x241   : > { %v1347_v23 = vpop.permute.xlu0 %1346 }
 0x242   : > { %v1343_v25 = vadd.f32 %v1341_v50, %v1308_v57  ;;  %v1342_v63 = vadd.f32 %v1340_v40, %v1307_v52  ;;  %v1356_v34 = vpop.permute.xlu1 %1355 }
 0x244   : > { %v1349_v56 = vadd.f32 %v1347_v23, %v1342_v63  ;;  %v1350_v28 = vadd.f32 %v1347_v23, %v1343_v25  ;;  %v1712_v25 = vld [vmem:[%s1817_s27] sm:$0xff] }
 0x245   : > { %v1378_v6 = vpop.permute.xlu0 %1377  ;;  %v468_v63 = vunpack.c.l.bf16 %v1712_v25 }
 0x246   : > { %v1351_v5 = vmax.f32 %v1349_v56, 0.0  ;;  %v1352_v33 = vmax.f32 %v1350_v28, 0.0  ;;  %v1393_v29 = vpop.permute.xlu1 %1392  ;;  %v1383_v13 = vrot.slane %v1378_v6, %v1937_v59  ;;  %v469_v56 = vunpack.c.h.bf16 %v1712_v25 }
 0x248   : > { %v1358_v49 = vmul.f32 %v1356_v34, %v1351_v5  ;;  %v1359_v0 = vmul.f32 %v1356_v34, %v1352_v33  ;;  %v1713_v5 = vld [vmem:[%s1817_s27 + $0x8] sm:$0xff] }
 0x249   : > { %v1398_v30 = vpop.permute.xlu0 %1397  ;;  %v470_v33 = vunpack.c.l.bf16 %v1713_v5 }
 0x24a   : > { %v1361_v42 = vsel %vm1360_vm6, %v1358_v49, 0.0  ;;  %v1368_v60 = vsel %vm1360_vm6, %v1359_v0, 0.0  ;;  %v1403_v54 = vpop.permute.xlu1 %1402  ;;  %v471_v0 = vunpack.c.h.bf16 %v1713_v5 }
 0x24b   : > { %v1362_v24 = vrot.slane %v1361_v42, 4  ;;  %v1369_v2 = vrot.slane %v1368_v60, 4 }
 0x24d   : > { %v1363_v43 = vadd.f32 %v1362_v24, %v1361_v42  ;;  %v1370_v32 = vadd.f32 %v1369_v2, %v1368_v60  ;;  %v1408_v45 = vpop.permute.xlu0 %1407 }
 0x24f   : > { %v1364_v55 = vrot.slane %v1363_v43, 2  ;;  %v1371_v16 = vrot.slane %v1370_v32, 2 }
 0x251   : > { %v1372_v7 = vadd.f32 %v1371_v16, %v1370_v32  ;;  %v1365_v18 = vadd.f32 %v1364_v55, %v1363_v43  ;;  %v1714_v43 = vld [vmem:[%s1817_s27 + $0x10] sm:$0xff] }
 0x252   : > { %v472_v32 = vunpack.c.l.bf16 %v1714_v43 }
 0x253   : > { %v1373_v58 = vrot.slane %v1372_v7, 1  ;;  %v1366_v19 = vrot.slane %v1365_v18, 1 }
 0x255   : > { %v1374_v48 = vadd.f32 %v1373_v58, %v1372_v7  ;;  %v1367_v51 = vadd.f32 %v1366_v19, %v1365_v18  ;;  %v473_v7 = vunpack.c.h.bf16 %v1714_v43 }
 0x257   : > { %v1384_v37 = vadd.f32 %v1383_v13, %v1367_v51  ;;  %v1385_v26 = vadd.f32 %v1383_v13, %v1374_v48 }
 0x259   : > { %v1410_v27 = vadd.f32 %v1393_v29, %v1384_v37  ;;  %v1411_v39 = vadd.f32 %v1393_v29, %v1385_v26  ;;  %v1412_v61 = vadd.f32 %v1398_v30, %v1384_v37  ;;  %v1413_v53 = vadd.f32 %v1398_v30, %v1385_v26  ;;  %v1715_v29 = vld [vmem:[%s1817_s27 + $0x18] sm:$0xff] }
 0x25a   : > { %v1414_v41 = vadd.f32 %v1403_v54, %v1384_v37  ;;  %v1415_v46 = vadd.f32 %v1403_v54, %v1385_v26  ;;  %v1416_v11 = vadd.f32 %v1408_v45, %v1384_v37  ;;  %v1417_v62 = vadd.f32 %v1408_v45, %v1385_v26 }
 0x25b   : > { %v1612_v4 = vmul.f32 -1.442695, %v1410_v27  ;;  %v1613_v3 = vmul.f32 -1.442695, %v1411_v39  ;;  %v1614_v9 = vmul.f32 -1.442695, %v1412_v61  ;;  %v474_v30 = vunpack.c.l.bf16 %v1715_v29 }
 0x25c   : > { %v1615_v12 = vmul.f32 -1.442695, %v1413_v53  ;;  %v1616_v38 = vmul.f32 -1.442695, %v1414_v41  ;;  %v1617_v59 = vmul.f32 -1.442695, %v1415_v46  ;;  %v475_v26 = vunpack.c.h.bf16 %v1715_v29 }
 0x25d   : > { %1680 = vpow2.f32 %v1612_v4  ;;  %v1618_v10 = vmul.f32 -1.442695, %v1416_v11  ;;  %v1619_v44 = vmul.f32 -1.442695, %v1417_v62 }
 0x25e   : > { %1682 = vpow2.f32 %v1613_v3 }
 0x25f   : > { %1684 = vpow2.f32 %v1614_v9 }
 0x260   : > { %1686 = vpow2.f32 %v1615_v12 }
 0x261   : > { %1688 = vpow2.f32 %v1616_v38 }
 0x262   : > { %1690 = vpow2.f32 %v1617_v59 }
 0x263   : > { %1692 = vpow2.f32 %v1618_v10 }
 0x264   : > { %1694 = vpow2.f32 %v1619_v44 }
 0x267   : > { %v1681_v15 = vpop.eup %1680 }
 0x268   : > { %v1683_v20 = vpop.eup %1682  ;;  %v1442_v14 = vadd.f32 1.0, %v1681_v15 }
 0x269   : > { %v1685_v31 = vpop.eup %1684  ;;  %v1443_v47 = vadd.f32 1.0, %v1683_v20 }
 0x26a   : > { %v1687_v21 = vpop.eup %1686  ;;  %1696 = vrcp.f32 %v1442_v14  ;;  %v1444_v22 = vadd.f32 1.0, %v1685_v31 }
 0x26b   : > { %v1689_v35 = vpop.eup %1688  ;;  %1698 = vrcp.f32 %v1443_v47  ;;  %v1445_v8 = vadd.f32 1.0, %v1687_v21 }
 0x26c   : > { %v1691_v1 = vpop.eup %1690  ;;  %1700 = vrcp.f32 %v1444_v22  ;;  %v1446_v36 = vadd.f32 1.0, %v1689_v35 }
 0x26d   : > { %v1693_v17 = vpop.eup %1692  ;;  %1702 = vrcp.f32 %v1445_v8  ;;  %v1447_v40 = vadd.f32 1.0, %v1691_v1 }
 0x26e   : > { %v1695_v50 = vpop.eup %1694  ;;  %1704 = vrcp.f32 %v1446_v36  ;;  %v1448_v57 = vadd.f32 1.0, %v1693_v17 }
 0x26f   : > { %1706 = vrcp.f32 %v1447_v40  ;;  %v1449_v52 = vadd.f32 1.0, %v1695_v50 }
 0x270   : > { %1708 = vrcp.f32 %v1448_v57 }
 0x271   : > { %1710 = vrcp.f32 %v1449_v52 }
 0x274   : > { %v1697_v23 = vpop.eup %1696 }
 0x275   : > { %v1699_v28 = vpop.eup %1698  ;;  %v1466_v34 = vadd.f32 1.0, %v1697_v23 }
 0x276   : > { %v1701_v49 = vpop.eup %1700  ;;  %v1467_v42 = vadd.f32 1.0, %v1699_v28 }
 0x277   : > { %v1703_v60 = vpop.eup %1702  ;;  %v1474_v24 = vmul.f32 %v1466_v34, %v468_v63  ;;  %v1468_v2 = vadd.f32 1.0, %v1701_v49 }
 0x278   : > { %v1705_v6 = vpop.eup %1704  ;;  %v1475_v55 = vmul.f32 %v1467_v42, %v469_v56  ;;  %v1469_v16 = vadd.f32 1.0, %v1703_v60 }
 0x279   : > { %v1707_v18 = vpop.eup %1706  ;;  %v1476_v58 = vmul.f32 %v1468_v2, %v470_v33  ;;  %v1470_v19 = vadd.f32 1.0, %v1705_v6 }
 0x27a   : > { %v1709_v48 = vpop.eup %1708  ;;  %v1629_v51 = vpack.c.bf16 %v1475_v55, %v1474_v24  ;;  %v1477_v13 = vmul.f32 %v1469_v16, %v471_v0  ;;  %v1471_v37 = vadd.f32 1.0, %v1707_v18 }
 0x27b   : > { %v1711_v27 = vpop.eup %1710  ;;  %v1478_v39 = vmul.f32 %v1470_v19, %v472_v32  ;;  %v1472_v61 = vadd.f32 1.0, %v1709_v48 }
 0x27c   : > { %1506 = vst [vmem:[%s408_s20] sm:$0xff] %v1629_v51  ;;  %v1630_v53 = vpack.c.bf16 %v1477_v13, %v1476_v58  ;;  %v1479_v54 = vmul.f32 %v1471_v37, %v473_v7  ;;  %v1473_v41 = vadd.f32 1.0, %v1711_v27 }
 0x27d   : > { %v1480_v46 = vmul.f32 %v1472_v61, %v474_v30 }
 0x27e   : > { %1507 = vst [vmem:[%s408_s20 + $0x8] sm:$0xff] %v1630_v53  ;;  %v1631_v45 = vpack.c.bf16 %v1479_v54, %v1478_v39  ;;  %v1481_v4 = vmul.f32 %v1473_v41, %v475_v26 }
 0x280   : > { %1508 = vst [vmem:[%s408_s20 + $0x10] sm:$0xff] %v1631_v45  ;;  %v1632_v3 = vpack.c.bf16 %v1481_v4, %v1480_v46 }
 0x282   : > { %1509 = vst [vmem:[%s408_s20 + $0x18] sm:$0xff] %v1632_v3 }
 0x283 PF: > { %s23_s19 = sadd.s32 1, %s1722_s19  }
 0x284   : > { %p20_p4 = scmp.ge.s32.totalorder %s23_s19, 4  }
 0x286   :  { %22 = sbr.rel (!%p20_p4) target bundleno = 3 (0x3), region = 120 }

</bundles_post_ra>
